<compile_context>
chip_gen: v5e
topology: v5e:2x2
jax: 0.10.0
libtpu: 0.0.40
codegen_flags: <defaults>
</compile_context>

<pallas_src>
import math

import jax
import jax.numpy as jnp
from jax import lax
from jax.experimental import pallas as pl
from jax.experimental.pallas import tpu as pltpu

_LANE = 128  # TPU vreg lane width; per-group blocks are padded to multiples of this.


def _round_up(x, m):
    return ((x + m - 1) // m) * m


def _choose_batch_tile(batch, max_frames, row_target=256):
    """Batch tile so each grid step feeds ~row_target matmul rows (raise to ~512 on
    v6e); keep at least 2 grid steps when the batch allows it (v7x megacore)."""
    tb = max(1, row_target // max(max_frames, 1))
    tb = min(tb, batch)
    if batch >= 2 and batch <= tb:
        tb = pl.cdiv(batch, 2)
    return tb


def _make_kernel(TB, M, F, G, NFp, Cp, mxu_dtype):
    R = TB * M  # rows fed to the FC matmuls per grid step

    def kernel(x_ref, ew_ref, eb_ref, aw_ref, ab_ref, cw_ref, cb_ref,
               cw2_ref, gamma_ref, beta_ref, vlad_ref):
        # (TB, M, F) bf16 -> (R, F): leading-dim collapse, lane dim unchanged.
        x2 = x_ref[...].reshape(R, F)

        # Expansion FC in the group-padded layout: (R, F) @ (F, G*NFp).
        x_exp = jnp.dot(x2, ew_ref[...],
                        preferred_element_type=jnp.float32) + eb_ref[...]      # (R, G*NFp) f32
        x_exp_mm = x_exp.astype(mxu_dtype)   # single bf16 copy used everywhere below

        # Per-frame group attention: logistic via the EUP approx reciprocal.
        att_logits = jnp.dot(x_exp_mm, aw_ref[...],
                             preferred_element_type=jnp.float32) + ab_ref[...]  # (R, G)
        att = pl.reciprocal(1.0 + jnp.exp(-att_logits), approx=True)

        # Cluster-assignment logits for all groups at once; cb carries a -1e9 bias
        # on padded cluster columns so the softmax ignores them.
        act = jnp.dot(x_exp_mm, cw_ref[...],
                      preferred_element_type=jnp.float32) + cb_ref[...]         # (R, G*Cp)

        # Vectorized softmax over clusters, all groups at once (lane dim = Cp).
        act3 = act.reshape(R, G, Cp)
        mx = jnp.max(act3, axis=-1, keepdims=True)
        e = jnp.exp(act3 - mx)
        s = jnp.sum(e, axis=-1, keepdims=True)
        scale = att.reshape(R, G, 1) * pl.reciprocal(s, approx=True)
        p = e * scale                                                            # (R, G, Cp) f32

        # Soft cluster counts: sum over frames and groups per batch element.
        a_sum = jnp.sum(p.reshape(TB, M * G, Cp), axis=1, keepdims=True)         # (TB, 1, Cp)

        # Single batched VLAD contraction with K = M*G (fills the MXU pipeline,
        # keeps the accumulation inside the MXU result path).
        xg = x_exp_mm.reshape(TB, M * G, NFp)
        pg = p.astype(mxu_dtype).reshape(TB, M * G, Cp)
        vlad = lax.dot_general(
            xg, pg, dimension_numbers=(((1,), (1,)), ((0,), (0,))),
            preferred_element_type=jnp.float32)                                 # (TB, NFp, Cp)

        vlad = vlad - a_sum * cw2_ref[...][None]

        # L2 normalize over the new-feature dim (torch dim=1, eps=1e-12);
        # rsqrt(max(ssq, eps^2)) == 1 / max(sqrt(ssq), eps), runs on the EUP.
        ssq = jnp.sum(vlad * vlad, axis=1, keepdims=True)                        # (TB, 1, Cp)
        vlad = vlad * lax.rsqrt(jnp.maximum(ssq, 1e-24))

        # BatchNorm1d (inference form) + bf16 store (halves HBM writeback).
        vlad_ref[...] = (vlad * gamma_ref[...][None]
                         + beta_ref[...][None]).astype(vlad_ref.dtype)

    return kernel


def nextvlad_forward(x, params, *, expansion, groups, cluster_size, output_dim,
                     batch_tile=None, row_target=256, mxu_dtype=jnp.bfloat16):
    B, M, F = x.shape
    assert M % 8 == 0, "max_frames must be a multiple of 8 (sublane alignment)"
    EF = expansion * F
    G, C = groups, cluster_size
    NF = EF // G
    NFp = _round_up(NF, _LANE)
    Cp = _round_up(C, _LANE)
    eps = 1e-5
    f32 = jnp.float32

    # ---- group-padded, lane-aligned parameters (cheap one-time XLA ops) ----
    # Each group's NF (resp. C) block is zero-padded to NFp (resp. Cp) so that
    # every in-kernel group slice/reshape stays on a 128-lane boundary. The
    # zero-padding is load-bearing: padded vlad entries come out exactly zero.
    ew_p = jnp.pad(params["expand_w"].astype(f32).reshape(F, G, NF),
                   ((0, 0), (0, 0), (0, NFp - NF))
                   ).reshape(F, G * NFp).astype(mxu_dtype)
    eb_p = jnp.pad(params["expand_b"].astype(f32).reshape(G, NF),
                   ((0, 0), (0, NFp - NF))).reshape(1, G * NFp)
    aw_p = jnp.pad(params["att_w"].astype(f32).reshape(G, NF, G),
                   ((0, 0), (0, NFp - NF), (0, 0))
                   ).reshape(G * NFp, G).astype(mxu_dtype)
    ab = params["att_b"].astype(f32).reshape(1, G)
    cw_p = jnp.pad(params["cluster_w"].astype(f32).reshape(G, NF, G, C),
                   ((0, 0), (0, NFp - NF), (0, 0), (0, Cp - C))
                   ).reshape(G * NFp, G * Cp).astype(mxu_dtype)
    # -1e9 logit bias on padded cluster columns -> exp() underflows to 0.
    cb = jnp.pad(jnp.zeros((G, C), f32), ((0, 0), (0, Cp - C)),
                 constant_values=-1e9).reshape(1, G * Cp)
    cw2_p = jnp.pad(params["cluster_w2"].astype(f32).reshape(NF, C),
                    ((0, NFp - NF), (0, Cp - C)))

    # Fold BN running stats into an affine transform (inference form).
    inv_std = 1.0 / jnp.sqrt(params["bn_var"].astype(f32) + eps)
    gamma_eff = (params["bn_gamma"] * inv_std).reshape(NF, C)
    beta_eff = (params["bn_beta"] -
                params["bn_mean"] * params["bn_gamma"] * inv_std).reshape(NF, C)
    gamma_p = jnp.pad(gamma_eff.astype(f32), ((0, NFp - NF), (0, Cp - C)))
    beta_p = jnp.pad(beta_eff.astype(f32), ((0, NFp - NF), (0, Cp - C)))

    # ---- batch tiling: pad the batch instead of hunting for divisors ----
    TB = batch_tile if batch_tile is not None else _choose_batch_tile(B, M, row_target)
    Bp = _round_up(B, TB)
    x_pad = x if Bp == B else jnp.pad(x, ((0, Bp - B), (0, 0), (0, 0)))

    kernel = _make_kernel(TB, M, F, G, NFp, Cp, mxu_dtype)

    def _const_spec(shape):
        # Constant blocks: same index every grid step -> single-buffer them.
        zeros = (0,) * len(shape)
        return pl.BlockSpec(shape, lambda b, _z=zeros: _z,
                            pipeline_mode=pl.Buffered(1))

    # ---- VMEM budget estimate -> explicit compiler limit (v5e default is 16 MiB) ----
    itm = jnp.dtype(mxu_dtype).itemsize
    R = TB * M
    est = (F * G * NFp * itm + G * NFp * 4            # ew_p, eb_p
           + G * NFp * G * itm + G * 4                # aw_p, ab
           + G * NFp * G * Cp * itm + G * Cp * 4      # cw_p, cb
           + 3 * NFp * Cp * 4                         # cw2_p, gamma_p, beta_p
           + 2 * TB * M * F * itm                     # double-buffered input block
           + 2 * TB * NFp * Cp * 2                    # double-buffered bf16 output block
           + R * G * NFp * (4 + itm)                  # x_exp (f32) + x_exp_mm (bf16)
           + R * G * Cp * (2 * 4 + itm)               # act/p (f32) + pg (bf16)
           + 2 * TB * NFp * Cp * 4)                   # vlad f32 accumulator + temp
    vmem_limit = int(min(max(2 * est + (8 << 20), 32 << 20), 96 << 20))

    vlad = pl.pallas_call(
        kernel,
        out_shape=jax.ShapeDtypeStruct((Bp, NFp, Cp), jnp.bfloat16),
        grid=(Bp // TB,),
        in_specs=[
            pl.BlockSpec((TB, M, F), lambda b: (b, 0, 0)),        # batch-tiled bf16 input
            _const_spec((F, G * NFp)), _const_spec((1, G * NFp)),
            _const_spec((G * NFp, G)), _const_spec((1, G)),
            _const_spec((G * NFp, G * Cp)), _const_spec((1, G * Cp)),
            _const_spec((NFp, Cp)),
            _const_spec((NFp, Cp)), _const_spec((NFp, Cp)),
        ],
        out_specs=pl.BlockSpec((TB, NFp, Cp), lambda b: (b, 0, 0)),  # lane-dense store
        compiler_params=pltpu.CompilerParams(
            dimension_semantics=("parallel",),
            vmem_limit_bytes=vmem_limit),
    )(x_pad.astype(mxu_dtype), ew_p, eb_p, aw_p, ab, cw_p, cb, cw2_p,
      gamma_p, beta_p)

    # Hidden FC as one batched bf16 XLA GEMM (f32 accumulation) on the padded
    # layout: hidden_w is zero-padded to (NFp*Cp, O), padded vlad entries are
    # exactly zero, so this is numerically identical while the reshape of the
    # kernel output stays a free contiguous view (no relayout copy).
    hw_p = jnp.pad(params["hidden_w"].astype(f32).reshape(NF, C, output_dim),
                   ((0, NFp - NF), (0, Cp - C), (0, 0))
                   ).reshape(NFp * Cp, output_dim).astype(mxu_dtype)
    out = jnp.dot(vlad.reshape(Bp, NFp * Cp), hw_p,
                  preferred_element_type=f32) + params["hidden_b"].astype(f32)
    return out[:B]


def nextvlad_reference(x, params, *, expansion, groups, cluster_size, output_dim):
    """Pure-JAX f32 reference mirroring the PyTorch forward (eval-mode BN)."""
    B, M, F = x.shape
    EF = expansion * F
    G, C, O = groups, cluster_size, output_dim
    NF = EF // G
    eps = 1e-5

    x_exp = x @ params["expand_w"] + params["expand_b"]                       # (B, M, EF)
    att = jax.nn.sigmoid(x_exp @ params["att_w"] + params["att_b"])           # (B, M, G)
    att = att.reshape(B, M * G, 1)
    act = (x_exp.reshape(B * M, EF) @ params["cluster_w"]).reshape(B, M * G, C)
    act = jax.nn.softmax(act, axis=-1) * att
    a_sum = jnp.sum(act, axis=-2, keepdims=True)                              # (B, 1, C)
    a = a_sum * params["cluster_w2"]                                          # (B, NF, C)
    act_t = jnp.transpose(act, (0, 2, 1))                                     # (B, C, M*G)
    rsh = x_exp.reshape(B, M * G, NF)
    vlad = jnp.transpose(act_t @ rsh, (0, 2, 1)) - a                          # (B, NF, C)
    norm = jnp.sqrt(jnp.sum(vlad * vlad, axis=1, keepdims=True))
    vlad = vlad / jnp.maximum(norm, 1e-12)
    vlad = vlad.reshape(B, NF * C)
    vlad = ((vlad - params["bn_mean"]) / jnp.sqrt(params["bn_var"] + eps)
            * params["bn_gamma"] + params["bn_beta"])
    return vlad @ params["hidden_w"] + params["hidden_b"]


if __name__ == "__main__":
    # Small, consistent shapes: feature_size=16, max_frames=8, cluster_size=8,
    # output_dim=32, expansion=2, groups=4  ->  EF=32, NF=8, output_feat=64.
    B, M, F = 2, 8, 16
    expansion, groups, cluster_size, output_dim = 2, 4, 8, 32
    EF = expansion * F
    NF = EF // groups
    OFS = NF * cluster_size

    key = jax.random.PRNGKey(0)
    keys = jax.random.split(key, 8)
    stdv_exp = 1.0 / math.sqrt(EF)
    stdv_att = 1.0 / math.sqrt(groups)
    stdv_clu = 1.0 / math.sqrt(cluster_size)
    stdv_hid = 1.0 / math.sqrt(OFS)

    params = {
        "expand_w": jax.random.uniform(keys[0], (F, EF), jnp.float32, -stdv_exp, stdv_exp),
        "expand_b": jax.random.uniform(keys[1], (EF,), jnp.float32, -stdv_exp, stdv_exp),
        "att_w": jax.random.uniform(keys[2], (EF, groups), jnp.float32, -stdv_att, stdv_att),
        "att_b": jax.random.uniform(keys[3], (groups,), jnp.float32, -stdv_att, stdv_att),
        "cluster_w": jax.random.uniform(keys[4], (EF, groups * cluster_size),
                                        jnp.float32, -stdv_clu, stdv_clu),
        "cluster_w2": jax.random.uniform(keys[5], (1, NF, cluster_size),
                                         jnp.float32, -stdv_clu, stdv_clu),
        # Fresh BatchNorm1d: gamma=1, beta=0, running_mean=0, running_var=1.
        "bn_gamma": jnp.ones((OFS,), jnp.float32),
        "bn_beta": jnp.zeros((OFS,), jnp.float32),
        "bn_mean": jnp.zeros((OFS,), jnp.float32),
        "bn_var": jnp.ones((OFS,), jnp.float32),
        "hidden_w": jax.random.uniform(keys[6], (OFS, output_dim),
                                       jnp.float32, -stdv_hid, stdv_hid),
        "hidden_b": jax.random.uniform(keys[7], (output_dim,),
                                       jnp.float32, -stdv_hid, stdv_hid),
    }

    x = jax.random.normal(jax.random.PRNGKey(42), (B, M, F), jnp.float32)

    out = nextvlad_forward(x, params, expansion=expansion, groups=groups,
                           cluster_size=cluster_size, output_dim=output_dim)
    out = jax.block_until_ready(out)

    ref = nextvlad_reference(x, params, expansion=expansion, groups=groups,
                             cluster_size=cluster_size, output_dim=output_dim)

    assert out.shape == (B, output_dim), out.shape
    # Kernel uses bf16 MXU operands everywhere (f32 accumulation), a bf16 vlad
    # intermediate, and EUP approx reciprocals -> compare against the f32
    # reference at a correspondingly loosened tolerance.
    assert jnp.allclose(out, ref, atol=3e-2, rtol=3e-2), \
        f"max abs diff = {jnp.max(jnp.abs(out - ref))}"
    print("KERNEL_OK")
</pallas_src>

<mosaic_0001>
module attributes {stable_mosaic.version = 11 : i64} {
  func.func @kernel(%arg0: i32, %arg1: memref<1x8x16xbf16, #tpu.memory_space<vmem>>, %arg2: memref<16x512xbf16, #tpu.memory_space<vmem>>, %arg3: memref<1x512xf32, #tpu.memory_space<vmem>>, %arg4: memref<512x4xbf16, #tpu.memory_space<vmem>>, %arg5: memref<1x4xf32, #tpu.memory_space<vmem>>, %arg6: memref<512x512xbf16, #tpu.memory_space<vmem>>, %arg7: memref<1x512xf32, #tpu.memory_space<vmem>>, %arg8: memref<128x128xf32, #tpu.memory_space<vmem>>, %arg9: memref<128x128xf32, #tpu.memory_space<vmem>>, %arg10: memref<128x128xf32, #tpu.memory_space<vmem>>, %arg11: memref<1x128x128xbf16, #tpu.memory_space<vmem>>) attributes {dimension_semantics = [#tpu.dimension_semantics<parallel>], iteration_bounds = array<i64: 2>, scalar_prefetch = 0 : i64, scratch_operands = 0 : i64, tpu.core_type = #tpu.core_type<tc>, window_params = [{transform_indices = @transform_0, window_bounds = array<i64: 1, 8, 16>}, {pipeline_mode = #tpu.pipeline_mode<synchronous>, transform_indices = @transform_1, window_bounds = array<i64: 16, 512>}, {pipeline_mode = #tpu.pipeline_mode<synchronous>, transform_indices = @transform_2, window_bounds = array<i64: 1, 512>}, {pipeline_mode = #tpu.pipeline_mode<synchronous>, transform_indices = @transform_3, window_bounds = array<i64: 512, 4>}, {pipeline_mode = #tpu.pipeline_mode<synchronous>, transform_indices = @transform_4, window_bounds = array<i64: 1, 4>}, {pipeline_mode = #tpu.pipeline_mode<synchronous>, transform_indices = @transform_5, window_bounds = array<i64: 512, 512>}, {pipeline_mode = #tpu.pipeline_mode<synchronous>, transform_indices = @transform_6, window_bounds = array<i64: 1, 512>}, {pipeline_mode = #tpu.pipeline_mode<synchronous>, transform_indices = @transform_7, window_bounds = array<i64: 128, 128>}, {pipeline_mode = #tpu.pipeline_mode<synchronous>, transform_indices = @transform_8, window_bounds = array<i64: 128, 128>}, {pipeline_mode = #tpu.pipeline_mode<synchronous>, transform_indices = @transform_9, window_bounds = array<i64: 128, 128>}, {transform_indices = @transform_10, window_bounds = array<i64: 1, 128, 128>}]} {
    %c0 = arith.constant 0 : index
    %c0_0 = arith.constant 0 : index
    %c0_1 = arith.constant 0 : index
    %0 = vector.load %arg1[%c0, %c0_0, %c0_1] : memref<1x8x16xbf16, #tpu.memory_space<vmem>>, vector<1x8x16xbf16>
    %1 = vector.shape_cast %0 : vector<1x8x16xbf16> to vector<8x16xbf16>
    %c0_2 = arith.constant 0 : index
    %c0_3 = arith.constant 0 : index
    %2 = vector.load %arg2[%c0_2, %c0_3] : memref<16x512xbf16, #tpu.memory_space<vmem>>, vector<16x512xbf16>
    %cst = arith.constant dense<0.000000e+00> : vector<8x512xf32>
    %3 = tpu.matmul %1, %2, %cst {dimension_numbers = #tpu.dot_dimension_numbers<[1], [0], [0], [1], [0, 0, 1, 1], [], []>} : vector<8x16xbf16>, vector<16x512xbf16>, vector<8x512xf32> -> vector<8x512xf32>
    %c0_4 = arith.constant 0 : index
    %c0_5 = arith.constant 0 : index
    %4 = vector.load %arg3[%c0_4, %c0_5] : memref<1x512xf32, #tpu.memory_space<vmem>>, vector<1x512xf32>
    %5 = vector.broadcast %4 : vector<1x512xf32> to vector<8x512xf32>
    %6 = arith.addf %3, %5 : vector<8x512xf32>
    %7 = arith.truncf %6 : vector<8x512xf32> to vector<8x512xbf16>
    %c0_6 = arith.constant 0 : index
    %c0_7 = arith.constant 0 : index
    %8 = vector.load %arg4[%c0_6, %c0_7] : memref<512x4xbf16, #tpu.memory_space<vmem>>, vector<512x4xbf16>
    %cst_8 = arith.constant dense<0.000000e+00> : vector<8x4xf32>
    %9 = tpu.matmul %7, %8, %cst_8 {dimension_numbers = #tpu.dot_dimension_numbers<[1], [0], [0], [1], [0, 0, 1, 1], [], []>} : vector<8x512xbf16>, vector<512x4xbf16>, vector<8x4xf32> -> vector<8x4xf32>
    %c0_9 = arith.constant 0 : index
    %c0_10 = arith.constant 0 : index
    %10 = vector.load %arg5[%c0_9, %c0_10] : memref<1x4xf32, #tpu.memory_space<vmem>>, vector<1x4xf32>
    %11 = vector.broadcast %10 : vector<1x4xf32> to vector<8x4xf32>
    %12 = arith.addf %9, %11 : vector<8x4xf32>
    %cst_11 = arith.constant 0.000000e+00 : f32
    %13 = vector.broadcast %cst_11 : f32 to vector<8x4xf32>
    %14 = arith.subf %13, %12 : vector<8x4xf32>
    %15 = math.exp %14 : vector<8x4xf32>
    %cst_12 = arith.constant 1.000000e+00 : f32
    %16 = vector.broadcast %cst_12 : f32 to vector<8x4xf32>
    %17 = arith.addf %16, %15 : vector<8x4xf32>
    %18 = tpu.reciprocal %17 {approx = true} : vector<8x4xf32> -> vector<8x4xf32>
    %c0_13 = arith.constant 0 : index
    %c0_14 = arith.constant 0 : index
    %19 = vector.load %arg6[%c0_13, %c0_14] : memref<512x512xbf16, #tpu.memory_space<vmem>>, vector<512x512xbf16>
    %cst_15 = arith.constant dense<0.000000e+00> : vector<8x512xf32>
    %20 = tpu.matmul %7, %19, %cst_15 {dimension_numbers = #tpu.dot_dimension_numbers<[1], [0], [0], [1], [0, 0, 1, 1], [], []>} : vector<8x512xbf16>, vector<512x512xbf16>, vector<8x512xf32> -> vector<8x512xf32>
    %c0_16 = arith.constant 0 : index
    %c0_17 = arith.constant 0 : index
    %21 = vector.load %arg7[%c0_16, %c0_17] : memref<1x512xf32, #tpu.memory_space<vmem>>, vector<1x512xf32>
    %22 = vector.broadcast %21 : vector<1x512xf32> to vector<8x512xf32>
    %23 = arith.addf %20, %22 : vector<8x512xf32>
    %24 = vector.shape_cast %23 : vector<8x512xf32> to vector<8x4x128xf32>
    %cst_18 = arith.constant dense<0xFF800000> : vector<8x4xf32>
    %25 = vector.multi_reduction <maximumf>, %24, %cst_18 [2] : vector<8x4x128xf32> to vector<8x4xf32>
    %26 = vector.shape_cast %25 : vector<8x4xf32> to vector<8x4x1xf32>
    %27 = vector.broadcast %26 : vector<8x4x1xf32> to vector<8x4x128xf32>
    %28 = arith.subf %24, %27 : vector<8x4x128xf32>
    %29 = math.exp %28 : vector<8x4x128xf32>
    %cst_19 = arith.constant dense<0.000000e+00> : vector<8x4xf32>
    %30 = vector.multi_reduction <add>, %29, %cst_19 [2] : vector<8x4x128xf32> to vector<8x4xf32>
    %31 = vector.shape_cast %30 : vector<8x4xf32> to vector<8x4x1xf32>
    %32 = vector.shape_cast %18 : vector<8x4xf32> to vector<8x4x1xf32>
    %33 = tpu.reciprocal %31 {approx = true} : vector<8x4x1xf32> -> vector<8x4x1xf32>
    %34 = arith.mulf %32, %33 : vector<8x4x1xf32>
    %35 = vector.broadcast %34 : vector<8x4x1xf32> to vector<8x4x128xf32>
    %36 = arith.mulf %29, %35 : vector<8x4x128xf32>
    %37 = vector.shape_cast %36 : vector<8x4x128xf32> to vector<1x32x128xf32>
    %cst_20 = arith.constant dense<0.000000e+00> : vector<1x128xf32>
    %38 = vector.multi_reduction <add>, %37, %cst_20 [1] : vector<1x32x128xf32> to vector<1x128xf32>
    %39 = vector.shape_cast %38 : vector<1x128xf32> to vector<1x1x128xf32>
    %40 = vector.shape_cast %7 : vector<8x512xbf16> to vector<1x32x128xbf16>
    %41 = arith.truncf %36 : vector<8x4x128xf32> to vector<8x4x128xbf16>
    %42 = vector.shape_cast %41 : vector<8x4x128xbf16> to vector<1x32x128xbf16>
    %cst_21 = arith.constant dense<0.000000e+00> : vector<1x128x128xf32>
    %43 = tpu.matmul %40, %42, %cst_21 {dimension_numbers = #tpu.dot_dimension_numbers<[1], [1], [2], [2], [0, 0, 0, 2, 1, 2], [0], [0]>} : vector<1x32x128xbf16>, vector<1x32x128xbf16>, vector<1x128x128xf32> -> vector<1x128x128xf32>
    %c0_22 = arith.constant 0 : index
    %c0_23 = arith.constant 0 : index
    %44 = vector.load %arg8[%c0_22, %c0_23] : memref<128x128xf32, #tpu.memory_space<vmem>>, vector<128x128xf32>
    %45 = vector.shape_cast %44 : vector<128x128xf32> to vector<1x128x128xf32>
    %46 = vector.broadcast %39 : vector<1x1x128xf32> to vector<1x128x128xf32>
    %47 = arith.mulf %46, %45 : vector<1x128x128xf32>
    %48 = arith.subf %43, %47 : vector<1x128x128xf32>
    %49 = arith.mulf %48, %48 : vector<1x128x128xf32>
    %cst_24 = arith.constant dense<0.000000e+00> : vector<1x128xf32>
    %50 = vector.multi_reduction <add>, %49, %cst_24 [1] : vector<1x128x128xf32> to vector<1x128xf32>
    %51 = vector.shape_cast %50 : vector<1x128xf32> to vector<1x1x128xf32>
    %cst_25 = arith.constant 1.000000e-24 : f32
    %52 = vector.broadcast %cst_25 : f32 to vector<1x1x128xf32>
    %53 = arith.maximumf %51, %52 : vector<1x1x128xf32>
    %54 = math.rsqrt %53 : vector<1x1x128xf32>
    %55 = vector.broadcast %54 : vector<1x1x128xf32> to vector<1x128x128xf32>
    %56 = arith.mulf %48, %55 : vector<1x128x128xf32>
    %c0_26 = arith.constant 0 : index
    %c0_27 = arith.constant 0 : index
    %57 = vector.load %arg9[%c0_26, %c0_27] : memref<128x128xf32, #tpu.memory_space<vmem>>, vector<128x128xf32>
    %58 = vector.shape_cast %57 : vector<128x128xf32> to vector<1x128x128xf32>
    %59 = arith.mulf %56, %58 : vector<1x128x128xf32>
    %c0_28 = arith.constant 0 : index
    %c0_29 = arith.constant 0 : index
    %60 = vector.load %arg10[%c0_28, %c0_29] : memref<128x128xf32, #tpu.memory_space<vmem>>, vector<128x128xf32>
    %61 = vector.shape_cast %60 : vector<128x128xf32> to vector<1x128x128xf32>
    %62 = arith.addf %59, %61 : vector<1x128x128xf32>
    %63 = arith.truncf %62 : vector<1x128x128xf32> to vector<1x128x128xbf16>
    %c0_30 = arith.constant 0 : index
    %c0_31 = arith.constant 0 : index
    %c0_32 = arith.constant 0 : index
    %64 = vector.load %arg11[%c0_30, %c0_31, %c0_32] : memref<1x128x128xbf16, #tpu.memory_space<vmem>>, vector<1x128x128xbf16>
    tpu.vector_store %arg11[%c0_30, %c0_31, %c0_32], %63 {strides = array<i32>} : memref<1x128x128xbf16, #tpu.memory_space<vmem>>, vector<1x128x128xbf16>,
    return
  }
  func.func @transform_0(%arg0: i32) -> (i32, i32, i32) {
    %c0_i32 = arith.constant 0 : i32
    %c0_i32_0 = arith.constant 0 : i32
    %c0_i32_1 = arith.constant 0 : i32
    return %arg0, %c0_i32, %c0_i32_0 : i32, i32, i32
  }
  func.func @transform_1(%arg0: i32) -> (i32, i32) {
    %c0_i32 = arith.constant 0 : i32
    %c0_i32_0 = arith.constant 0 : i32
    %c0_i32_1 = arith.constant 0 : i32
    return %c0_i32, %c0_i32_0 : i32, i32
  }
  func.func @transform_2(%arg0: i32) -> (i32, i32) {
    %c0_i32 = arith.constant 0 : i32
    %c0_i32_0 = arith.constant 0 : i32
    %c0_i32_1 = arith.constant 0 : i32
    return %c0_i32, %c0_i32_0 : i32, i32
  }
  func.func @transform_3(%arg0: i32) -> (i32, i32) {
    %c0_i32 = arith.constant 0 : i32
    %c0_i32_0 = arith.constant 0 : i32
    %c0_i32_1 = arith.constant 0 : i32
    return %c0_i32, %c0_i32_0 : i32, i32
  }
  func.func @transform_4(%arg0: i32) -> (i32, i32) {
    %c0_i32 = arith.constant 0 : i32
    %c0_i32_0 = arith.constant 0 : i32
    %c0_i32_1 = arith.constant 0 : i32
    return %c0_i32, %c0_i32_0 : i32, i32
  }
  func.func @transform_5(%arg0: i32) -> (i32, i32) {
    %c0_i32 = arith.constant 0 : i32
    %c0_i32_0 = arith.constant 0 : i32
    %c0_i32_1 = arith.constant 0 : i32
    return %c0_i32, %c0_i32_0 : i32, i32
  }
  func.func @transform_6(%arg0: i32) -> (i32, i32) {
    %c0_i32 = arith.constant 0 : i32
    %c0_i32_0 = arith.constant 0 : i32
    %c0_i32_1 = arith.constant 0 : i32
    return %c0_i32, %c0_i32_0 : i32, i32
  }
  func.func @transform_7(%arg0: i32) -> (i32, i32) {
    %c0_i32 = arith.constant 0 : i32
    %c0_i32_0 = arith.constant 0 : i32
    %c0_i32_1 = arith.constant 0 : i32
    return %c0_i32, %c0_i32_0 : i32, i32
  }
  func.func @transform_8(%arg0: i32) -> (i32, i32) {
    %c0_i32 = arith.constant 0 : i32
    %c0_i32_0 = arith.constant 0 : i32
    %c0_i32_1 = arith.constant 0 : i32
    return %c0_i32, %c0_i32_0 : i32, i32
  }
  func.func @transform_9(%arg0: i32) -> (i32, i32) {
    %c0_i32 = arith.constant 0 : i32
    %c0_i32_0 = arith.constant 0 : i32
    %c0_i32_1 = arith.constant 0 : i32
    return %c0_i32, %c0_i32_0 : i32, i32
  }
  func.func @transform_10(%arg0: i32) -> (i32, i32, i32) {
    %c0_i32 = arith.constant 0 : i32
    %c0_i32_0 = arith.constant 0 : i32
    %c0_i32_1 = arith.constant 0 : i32
    return %arg0, %c0_i32, %c0_i32_0 : i32, i32, i32
  }
}

</mosaic_0001>

<bundles_post_ra>
// kernel: tpu_custom_call.1
= control target key start
LH: loop header
LB: loop body
LE: loop exit
PB: predicated region body
PF: predicated region fallthrough
CT: control target
= control target key end

     0   :  { %s4434_s0 = inlined_call_operand.vmem [shape: bf16[2,8,16], index: 0, kind: input, shape index: {}]   ;;  %s4435_s1 = inlined_call_operand.hbm [shape: bf16[16,512], index: 1, kind: input, shape index: {}]   ;;  %s4436_s2 = inlined_call_operand.hbm [shape: f32[1,512], index: 2, kind: input, shape index: {}]   ;;  %s4437_s3 = inlined_call_operand.vmem [shape: bf16[512,4], index: 3, kind: input, shape index: {}]   ;;  %s4438_s4 = inlined_call_operand.vmem [shape: f32[1,4], index: 4, kind: input, shape index: {}]   ;;  %s4439_s5 = inlined_call_operand.hbm [shape: bf16[512,512], index: 5, kind: input, shape index: {}]   ;;  %s4440_s6 = inlined_call_operand.vmem [shape: f32[1,512], index: 6, kind: input, shape index: {}]   ;;  %s4441_s7 = inlined_call_operand.vmem [shape: f32[128,128], index: 7, kind: input, shape index: {}]   ;;  %s4442_s8 = inlined_call_operand.vmem [shape: f32[128,128], index: 8, kind: input, shape index: {}]   ;;  %s4443_s9 = inlined_call_operand.hbm [shape: f32[128,128], index: 9, kind: input, shape index: {}]   ;;  %s4444_s10 = inlined_call_operand.hbm [shape: bf16[2,128,128], index: 10, kind: output, shape index: {}]  }
   0x1   :  { %4449 = sst [smem:[#allocation19_spill]] %s4435_s1 }
   0x2   :  { %4450 = sst [smem:[#allocation20_spill]] %s4436_s2 }
   0x3   :  { %15 = vsyncpa [#allocation3], 0 }
   0x4   :  { %16 = vsyncpa [#allocation6], 0 }
   0x5   :  { %17 = vsyncpa [#allocation9], 0 }
   0x6   :  { %18 = vsyncpa [#allocation4], 0 }
   0x7   :  { %20 = vsyncpa [#allocation4 + $0x1], 0  ;;  %s3861_s13 = smov 0   ;;  %s3863_s14 = smov 0  }
   0x8   :  { %s3865_s15 = smov 0   ;;  %s3867_s16 = smov 0  }
   0x9 LB: > { %4451 = sst [smem:[#allocation15_spill]] %s3788_s15  ;;  %s3882_s17 = sadd.s32 4294967295, %s3792_s16   ;;  %s3792_s16 = sphi %s3867_s16, %s4462_s16   ;;  %s3788_s15 = sphi %s3865_s15, %s4464_s15   ;;  %s3784_s14 = sphi %s3863_s14, %s4466_s14   ;;  %s3780_s13 = sphi %s3861_s13, %s4465_s13  }
   0xa   : > { %s2568_s18 = sadd.s32 4294967294, %s3792_s16   ;;  %s3886_s19 = sadd.s32 1, %s3792_s16  }
   0xb   : > { %4452 = sst [smem:[#allocation16_spill]] %s3886_s19  ;;  %s248_s20 = sadd.s32 1, %s3788_s15 }
   0xc   : > { %s245_s21 = ssub.s32 %s3792_s16, %s3886_s19  ;;  %p258_p0 = scmp.ne.s32.totalorder %s3788_s15, %s3784_s14 }
   0xd   : > { %p246_p1 = scmp.eq.s32.totalorder %s245_s21, 0  ;;  %p259_p2 = scmp.eq.s32.totalorder %s3882_s17, 1 }
   0xe   : > { %p264_p3 = scmp.ne.s32.totalorder %s3784_s14, %s3780_s13  ;;  %p265_p4 = scmp.eq.s32.totalorder %s2568_s18, 1 }
   0xf   : > { %s3897_s22 = scalar_select %p246_p1, %s3788_s15, %s248_s20  }
  0x10   : > { %p3899_p5 = por %p259_p2, %p258_p0  ;;  %p3903_p6 = por %p265_p4, %p264_p3 }
  0x11   : > { %4453 = sst [smem:[#allocation17_spill]] %s3897_s22  ;;  %p2569_p7 = scmp.ge.s32.totalorder %s3792_s16, 1 }
  0x12   : > { %s4455_s24 = scalar_select %p3903_p6, 1, 0 }
  0x13   : > { %p272_p8 = scmp.lt.s32.totalorder %s3792_s16, 3  ;;  %p3502_p9 = scmp.eq.s32.totalorder %s3882_s17, 0 }
  0x14   : > { %4456 = sst [smem:[#allocation18_spill]] %s4455_s24  ;;  %s3794_s29 = smov [#allocation5]  }
  0x15   : > { %p3910_p10 = pnand %p2569_p7, %p272_p8  ;;  %s4458_s2 = sld [smem:[#allocation20_spill]] }
  0x16   : > { %s300_s30 = sshll.u32 %s3794_s29, 4  ;;  %s4459_s1 = sld [smem:[#allocation19_spill]]  ;;  %s301_s30 = int_to_ptr.vmem [resolvable:$true] %s300_s30 }
  0x17   : > { %p3485_p11 = pneg %p3910_p10  ;;  %s3795_s21 = smov [#allocation2]  }
  0x18   : > { %s285_s26 = sshll.u32 %s3795_s21, 4  ;;  %s3796_s27 = smov 256   ;;  %s286_s26 = int_to_ptr.vmem [resolvable:$true] %s285_s26 }
  0x19   : > { %p3924_p12 = pnand %p3502_p9, %p3485_p11  ;;  %s3797_s29 = smov 16  }
  0x1a   : > { %s338_s21 = sshll.u32 %s4443_s9, 4  ;;  %s3800_s24 = smov 128   ;;  %s339_s21 = int_to_ptr.hbm [resolvable:$true] %s338_s21 }
  0x1b   : > { %s298_s28 = sshll.u32 %s4458_s2, 4  ;;  %s3798_s2 = smov [#allocation7]   ;;  %s299_s28 = int_to_ptr.hbm [resolvable:$true] %s298_s28 }
  0x1c   : > { %s283_s18 = sshll.u32 %s4459_s1, 4  ;;  %s315_s1 = sshll.u32 %s4439_s5, 4  ;;  %s284_s18 = int_to_ptr.hbm [resolvable:$true] %s283_s18  ;;  %s316_s1 = int_to_ptr.hbm [resolvable:$true] %s315_s1 }
  0x1d   : > { %3491 = dma.hbm_to_vmem [thread:$0]  (!%p3924_p12), %s299_s28, 64, %s301_s30, [#allocation6]  }
  0x1e   : > { %3488 = dma.hbm_to_vmem [thread:$0]  (!%p3924_p12), %s284_s18, 512, %s286_s26, [#allocation3], %s3796_s27, %s3796_s27, %s3797_s29  }
  0x1f   : > { %s317_s22 = sshll.u32 %s3798_s2, 4  ;;  %s3799_s28 = smov [#allocation8]   ;;  %s318_s22 = int_to_ptr.vmem [resolvable:$true] %s317_s22 }
  0x20   : > { %3494 = dma.hbm_to_vmem [thread:$0]  (!%p3924_p12), %s316_s1, 16384, %s318_s22, [#allocation6], %s3796_s27, %s3796_s27, %s3797_s29  }
  0x21   : > { %s340_s30 = sshll.u32 %s3799_s28, 4  ;;  %s3801_s18 = smov 8   ;;  %s341_s30 = int_to_ptr.vmem [resolvable:$true] %s340_s30 }
  0x22   : > { %3497 = dma.hbm_to_vmem [thread:$0]  (!%p3924_p12), %s339_s21, 2048, %s341_s30, [#allocation9], %s3800_s24, %s3800_s24, %s3801_s18  }
  0x23   : > { %363 = sbr.rel (%p3910_p10) target bundleno = 1207 (0x4b7), region = 60 }
  0x28   : > { %3763 = dma.done.wait (%p3502_p9), [#allocation3], 512  }
  0x29   : > { %3765 = vsyncadd (%p3502_p9), [#allocation3], 4294966784 }
  0x2a   : > { %3767 = dma.done.wait (%p3502_p9), [#allocation6], 16448  }
  0x2b   : > { %3769 = vsyncadd (%p3502_p9), [#allocation6], 4294950848 }
  0x2c   : > { %3771 = dma.done.wait (%p3502_p9), [#allocation9], 2048  }
  0x2d   : > { %3773 = vsyncadd (%p3502_p9), [#allocation9], 4294965248  ;;  %p416_p13 = scmp.lt.s32.totalorder %s3882_s17, 1  ;;  %v2584_v0 = vld [vmem:[#allocation2] sm:$0xf]  ;;  %vm456_vm0 = vcmask 130048  }
  0x2e   : > { %v3257_v1 = vld [vmem:[#allocation2 + $0xc] sm:$0xf0]  ;;  %v3255_v2 = vld [vmem:[#allocation2 + $0x4] sm:$0xf]  ;;  %v2586_v4 = vld [vmem:[#allocation2 + $0x10] sm:$0xf0] }
  0x2f   : > { %s417_s1 = scalar_select %p416_p13, %s3882_s17, 1  ;;  %v2585_v3 = vor.u32 %v3257_v1, %v2584_v0  ;;  %v2592_v5 = vld [vmem:[#allocation2 + $0x8] sm:$0xf]  ;;  %v3258_v6 = vld [vmem:[#allocation2 + $0x14] sm:$0xf0]  ;;  %v2589_v7 = vor.u32 %v3255_v2, %v2586_v4  ;;  %v3266_v13 = vld [vmem:[%s4437_s3 + $0x38] sm:$0xff] }
  0x30   : > { %v2593_v8 = vor.u32 %v3258_v6, %v2592_v5  ;;  %v3256_v9 = vld [vmem:[#allocation2 + $0xc] sm:$0xf]  ;;  %v2594_v10 = vld [vmem:[#allocation2 + $0x18] sm:$0xf0]  ;;  %v3282_v14 = vld [vmem:[%s4437_s3 + $0xb8] sm:$0xff]  ;;  %vm2094_vm1 = vcmask 1043458  }
  0x31   : > { %s2581_s2 = sshll.u32 %s417_s1, 2  ;;  %467 = vmatpush.bf16.msra.mxu0 %v2585_v3  ;;  %v2597_v11 = vor.u32 %v3256_v9, %v2594_v10  ;;  %480 = vmatpush.bf16.msra.mxu1 %v2589_v7  ;;  %v3265_v15 = vld [vmem:[%s4437_s3 + $0x30] sm:$0xff]  ;;  %v3290_v16 = vld [vmem:[%s4437_s3 + $0xf8] sm:$0xff]  ;;  %v3322_v19 = vld [vmem:[#allocation7 + $0xf4] sm:$0xf0]  ;;  %vm2096_vm2 = vcmask 1045504  }
  0x32   : > { %s419_s22 = scalar_lea.vmem %s4434_s0, %s2581_s2  ;;  %493 = vmatpush.bf16.msra.mxu2 %v2593_v8  ;;  %v3281_v17 = vld [vmem:[%s4437_s3 + $0xb0] sm:$0xff]  ;;  %v3318_v22 = vld [vmem:[#allocation7 + $0xd4] sm:$0xf0]  ;;  %v3264_v23 = vld [vmem:[%s4437_s3 + $0x28] sm:$0xff]  ;;  %vm2084_vm3 = vcmask 1041408   ;;  %vm2088_vm4 = vcmask 1045508  }
  0x33   : > { %v421_v12 = vld [vmem:[%s419_s22] sm:$0xf]  ;;  %506 = vmatpush.bf16.msra.mxu3 %v2597_v11  ;;  %v2852_v18 = vld [vmem:[#allocation7 + $0xe8] sm:$0xf]  ;;  %v3280_v25 = vld [vmem:[%s4437_s3 + $0xa8] sm:$0xff]  ;;  %vm2098_vm5 = vcmask 1045506  }
  0x34   : > { %2598 = vmatmul.msk.bf16.vlgmr.msra.gmra.mxu0 %vm456_vm0, %v421_v12  ;;  %2599 = vmatmul.msk.bf16.vlgmr.msra.gmra.mxu1 %vm456_vm0, %v421_v12  ;;  %v2853_v20 = vor.u32 %v3322_v19, %v2852_v18  ;;  %v2836_v21 = vld [vmem:[#allocation7 + $0xc8] sm:$0xf]  ;;  %v3314_v28 = vld [vmem:[#allocation7 + $0xb4] sm:$0xf0]  ;;  %v3288_v30 = vld [vmem:[%s4437_s3 + $0xe8] sm:$0xff]  ;;  %vm1888_vm6 = vcmask 1043456  }
  0x35   : > { %788 = vmatpush.bf16.msrb.mxu1 %v3266_v13  ;;  %2600 = vmatmul.msk.bf16.vlgmr.msra.gmra.mxu2 %vm456_vm0, %v421_v12  ;;  %v3289_v24 = vld [vmem:[%s4437_s3 + $0xf0] sm:$0xff]  ;;  %v2837_v26 = vor.u32 %v3318_v22, %v2836_v21  ;;  %v3263_v29 = vld [vmem:[%s4437_s3 + $0x20] sm:$0xff]  ;;  %v3262_v35 = vld [vmem:[%s4437_s3 + $0x18] sm:$0xff]  ;;  %vm1832_vm7 = vcmask 1047556   ;;  %vm2167_vm8 = vcmask 261120   ;;  %s413_s24 = sand.u32 1, %s3784_s14  }
  0x36   : > { %814 = vmatpush.bf16.msrb.mxu2 %v3282_v14  ;;  %2601 = vmatmul.msk.bf16.vlgmr.msra.gmra.mxu3 %vm456_vm0, %v421_v12  ;;  %v2820_v27 = vld [vmem:[#allocation7 + $0xa8] sm:$0xf]  ;;  %v3279_v31 = vld [vmem:[%s4437_s3 + $0xa0] sm:$0xff]  ;;  %v3278_v37 = vld [vmem:[%s4437_s3 + $0x98] sm:$0xff]  ;;  %s4355_s19 = sshll.u32 %s413_s24, 6  ;;  %s3419_s20 = sshll.u32 %s3882_s17, 6 }
  0x37   : > { %827 = vmatpush.bf16.msrb.mxu3 %v3290_v16  ;;  %1727 = vmatpush.bf16.msrb.mxu0 %v2853_v20  ;;  %v2821_v32 = vor.u32 %v3314_v28, %v2820_v27  ;;  %v2804_v33 = vld [vmem:[#allocation7 + $0x88] sm:$0xf]  ;;  %v3310_v34 = vld [vmem:[#allocation7 + $0x94] sm:$0xf0]  ;;  %v3286_v42 = vld [vmem:[%s4437_s3 + $0xd8] sm:$0xff]  ;;  %s4390_s25 = scalar_lea.vmem [#allocation10], %s4355_s19  ;;  %s2461_s26 = scalar_lea.hbm %s4444_s10, %s3419_s20 }
  0x38   : > { %v3287_v36 = vld [vmem:[%s4437_s3 + $0xe0] sm:$0xff]  ;;  %v2805_v38 = vor.u32 %v3310_v34, %v2804_v33  ;;  %v2788_v39 = vld [vmem:[#allocation7 + $0x68] sm:$0xf]  ;;  %v3260_v47 = vld [vmem:[%s4437_s3 + $0x8] sm:$0xff]  ;;  %s2462_s27 = sshll.u32 %s4390_s25, 4  ;;  %s2464_s29 = sshll.u32 %s2461_s26, 4  ;;  %s2463_s27 = int_to_ptr.vmem [resolvable:$true] %s2462_s27  ;;  %s2465_s29 = int_to_ptr.hbm [resolvable:$true] %s2464_s29 }
  0x39   : > { %789 = vmatpush.bf16.msrb.mxu1 %v3265_v15  ;;  %v3306_v40 = vld [vmem:[#allocation7 + $0x74] sm:$0xf0]  ;;  %v3261_v41 = vld [vmem:[%s4437_s3 + $0x10] sm:$0xff]  ;;  %v3276_v49 = vld [vmem:[%s4437_s3 + $0x88] sm:$0xff]  ;;  %s2450_s11 = scalar_lea.sflag [#allocation4], %s413_s24  ;;  %s3732_s12 = sshra.s32 %s2465_s29, 4  ;;  %s3733_s12 = int_to_ptr.hbm [resolvable:$true] %s3732_s12 }
  0x3a   : > { %815 = vmatpush.bf16.msrb.mxu2 %v3281_v17  ;;  %v3277_v43 = vld [vmem:[%s4437_s3 + $0x90] sm:$0xff]  ;;  %v2789_v44 = vor.u32 %v3306_v40, %v2788_v39  ;;  %v3302_v46 = vld [vmem:[#allocation7 + $0x54] sm:$0xf0]  ;;  %v2844_v51 = vld [vmem:[#allocation7 + $0xe0] sm:$0xf]  ;;  %s3734_s21 = scalar_lea.hbm %s3733_s12, 64  ;;  %p3739_p3 = scmp.lt.s32.totalorder %s3733_s12, %s4444_s10 }
  0x3b   : > { %828 = vmatpush.bf16.msrb.mxu3 %v3289_v24  ;;  %1728 = vmatpush.bf16.msrb.mxu0 %v2837_v26  ;;  %v2772_v45 = vld [vmem:[#allocation7 + $0x48] sm:$0xf]  ;;  %v3321_v52 = vld [vmem:[#allocation7 + $0xec] sm:$0xf0]  ;;  %v3298_v54 = vld [vmem:[#allocation7 + $0x34] sm:$0xf0]  ;;  %p3735_p0 = scmp.ne.s32.totalorder %s3733_s12, %s3734_s21 }
  0x3c   : > { %v3285_v48 = vld [vmem:[%s4437_s3 + $0xd0] sm:$0xff]  ;;  %v2773_v50 = vor.u32 %v3302_v46, %v2772_v45  ;;  %v3259_v55 = vld [vmem:[%s4437_s3] sm:$0xff]  ;;  %v3284_v56 = vld [vmem:[%s4437_s3 + $0xc8] sm:$0xff]  ;;  %v2845_v59 = vor.u32 %v3321_v52, %v2844_v51  ;;  %s3738_s18 = scalar_lea.hbm %s4444_s10, 128 }
  0x3d   : > { %790 = vmatpush.bf16.msrb.mxu1 %v3264_v23  ;;  %v2756_v53 = vld [vmem:[#allocation7 + $0x28] sm:$0xf]  ;;  %v3274_v57 = vld [vmem:[%s4437_s3 + $0x78] sm:$0xff]  ;;  %v3275_v58 = vld [vmem:[%s4437_s3 + $0x80] sm:$0xff]  ;;  %p3736_p1 = pnand %p3735_p0, %p3899_p5  ;;  %p3740_p4 = scmp.lt.s32.totalorder %s3738_s18, %s3734_s21 }
  0x3e   : > { %816 = vmatpush.bf16.msrb.mxu2 %v3280_v25  ;;  %v3228_v60 = vld [vmem:[#allocation7 + $0x3e0] sm:$0xf]  ;;  %v3417_v61 = vld [vmem:[#allocation7 + $0x3ec] sm:$0xf0]  ;;  %v2757_v62 = vor.u32 %v3298_v54, %v2756_v53  ;;  %v2740_v1 = vld [vmem:[#allocation7 + $0x8] sm:$0xf] }
  0x3f   : > { %829 = vmatpush.bf16.msrb.mxu3 %v3288_v30  ;;  %1729 = vmatpush.bf16.msrb.mxu0 %v2821_v32  ;;  %v2828_v63 = vld [vmem:[#allocation7 + $0xc0] sm:$0xf]  ;;  %v3317_v0 = vld [vmem:[#allocation7 + $0xcc] sm:$0xf0]  ;;  %v3294_v2 = vld [vmem:[#allocation7 + $0x14] sm:$0xf0]  ;;  %v3229_v7 = vor.u32 %v3417_v61, %v3228_v60  ;;  %p3737_p2 = pneg %p3736_p1  ;;  %p3741_p7 = por %p3740_p4, %p3739_p3 }
  0x40   : > { %v3283_v3 = vld [vmem:[%s4437_s3 + $0xc0] sm:$0xff]  ;;  %v3320_v4 = vld [vmem:[#allocation7 + $0xec] sm:$0xf]  ;;  %v2854_v5 = vld [vmem:[#allocation7 + $0xf8] sm:$0xf0]  ;;  %v2829_v8 = vor.u32 %v3317_v0, %v2828_v63  ;;  %v2741_v11 = vor.u32 %v3294_v2, %v2740_v1 }
  0x41   : > { %791 = vmatpush.bf16.msrb.mxu1 %v3263_v29  ;;  %v3273_v6 = vld [vmem:[%s4437_s3 + $0x70] sm:$0xff]  ;;  %v3212_v9 = vld [vmem:[#allocation7 + $0x3c0] sm:$0xf]  ;;  %v3413_v10 = vld [vmem:[#allocation7 + $0x3cc] sm:$0xf0]  ;;  %v2857_v14 = vor.u32 %v3320_v4, %v2854_v5  ;;  %p3742_p8 = pnand %p3741_p7, %p3737_p2 }
  0x42   : > { %817 = vmatpush.bf16.msrb.mxu2 %v3279_v31  ;;  %v2812_v12 = vld [vmem:[#allocation7 + $0xa0] sm:$0xf]  ;;  %v3313_v13 = vld [vmem:[#allocation7 + $0xac] sm:$0xf0]  ;;  %v3316_v15 = vld [vmem:[#allocation7 + $0xcc] sm:$0xf]  ;;  %v3213_v18 = vor.u32 %v3413_v10, %v3212_v9 }
  0x43   : > { %830 = vmatpush.bf16.msrb.mxu3 %v3287_v36  ;;  %1730 = vmatpush.bf16.msrb.mxu0 %v2805_v38  ;;  %v2838_v16 = vld [vmem:[#allocation7 + $0xd8] sm:$0xf0]  ;;  %v2813_v19 = vor.u32 %v3313_v13, %v2812_v12  ;;  %v3196_v20 = vld [vmem:[#allocation7 + $0x3a0] sm:$0xf]  ;;  %v3409_v21 = vld [vmem:[#allocation7 + $0x3ac] sm:$0xf0] }
  0x44   : > { %v3272_v17 = vld [vmem:[%s4437_s3 + $0x68] sm:$0xff]  ;;  %v3309_v23 = vld [vmem:[#allocation7 + $0x8c] sm:$0xf0]  ;;  %v2841_v24 = vor.u32 %v3316_v15, %v2838_v16  ;;  %v3271_v25 = vld [vmem:[%s4437_s3 + $0x60] sm:$0xff]  ;;  %v3197_v26 = vor.u32 %v3409_v21, %v3196_v20 }
  0x45   : > { %792 = vmatpush.bf16.msrb.mxu1 %v3262_v35  ;;  %v2796_v22 = vld [vmem:[#allocation7 + $0x80] sm:$0xf]  ;;  %v3405_v29 = vld [vmem:[#allocation7 + $0x38c] sm:$0xf0]  ;;  %v3269_v32 = vld [vmem:[%s4437_s3 + $0x50] sm:$0xff] }
  0x46   : > { %818 = vmatpush.bf16.msrb.mxu2 %v3278_v37  ;;  %v2797_v27 = vor.u32 %v3309_v23, %v2796_v22  ;;  %v3180_v28 = vld [vmem:[#allocation7 + $0x380] sm:$0xf]  ;;  %v3270_v30 = vld [vmem:[%s4437_s3 + $0x58] sm:$0xff]  ;;  %v2822_v40 = vld [vmem:[#allocation7 + $0xb8] sm:$0xf0] }
  0x47   : > { %831 = vmatpush.bf16.msrb.mxu3 %v3286_v42  ;;  %1731 = vmatpush.bf16.msrb.mxu0 %v2789_v44  ;;  %v3181_v31 = vor.u32 %v3405_v29, %v3180_v28  ;;  %v2780_v33 = vld [vmem:[#allocation7 + $0x60] sm:$0xf]  ;;  %v3305_v34 = vld [vmem:[#allocation7 + $0x6c] sm:$0xf0]  ;;  %v3312_v38 = vld [vmem:[#allocation7 + $0xac] sm:$0xf] }
  0x48   : > { %v2781_v35 = vor.u32 %v3305_v34, %v2780_v33  ;;  %v3164_v36 = vld [vmem:[#allocation7 + $0x360] sm:$0xf]  ;;  %v3401_v37 = vld [vmem:[#allocation7 + $0x36c] sm:$0xf0]  ;;  %v3267_v52 = vld [vmem:[%s4437_s3 + $0x40] sm:$0xff] }
  0x49   : > { %793 = vmatpush.bf16.msrb.mxu1 %v3261_v41  ;;  %v3165_v39 = vor.u32 %v3401_v37, %v3164_v36  ;;  %v2825_v41 = vor.u32 %v3312_v38, %v2822_v40  ;;  %v3268_v42 = vld [vmem:[%s4437_s3 + $0x48] sm:$0xff]  ;;  %v3301_v44 = vld [vmem:[#allocation7 + $0x4c] sm:$0xf0]  ;;  %v3292_v10 = vld [vmem:[#allocation7 + $0xc] sm:$0xf] }
  0x4a   : > { %819 = vmatpush.bf16.msrb.mxu2 %v3277_v43  ;;  %v2764_v43 = vld [vmem:[#allocation7 + $0x40] sm:$0xf]  ;;  %v3297_v54 = vld [vmem:[#allocation7 + $0x2c] sm:$0xf0]  ;;  %v2774_v5 = vld [vmem:[#allocation7 + $0x58] sm:$0xf0] }
  0x4b   : > { %832 = vmatpush.bf16.msrb.mxu3 %v3285_v48  ;;  %1732 = vmatpush.bf16.msrb.mxu0 %v2773_v50  ;;  %v3148_v45 = vld [vmem:[#allocation7 + $0x340] sm:$0xf]  ;;  %v2765_v46 = vor.u32 %v3301_v44, %v2764_v43  ;;  %v3308_v48 = vld [vmem:[#allocation7 + $0x8c] sm:$0xf]  ;;  %v2806_v50 = vld [vmem:[#allocation7 + $0x98] sm:$0xf0] }
  0x4c   : > { %v2809_v51 = vor.u32 %v3308_v48, %v2806_v50  ;;  %v2748_v53 = vld [vmem:[#allocation7 + $0x20] sm:$0xf]  ;;  %v3293_v63 = vld [vmem:[#allocation7 + $0xc] sm:$0xf0]  ;;  %v426_v13 = vld [vmem:[#allocation5] sm:$0xf] }
  0x4d   : > { %794 = vmatpush.bf16.msrb.mxu1 %v3260_v47  ;;  %v3397_v47 = vld [vmem:[#allocation7 + $0x34c] sm:$0xf0]  ;;  %v3116_v0 = vld [vmem:[#allocation7 + $0x300] sm:$0xf]  ;;  %v429_v15 = vperm.slane %v426_v13, 1  ;;  %v430_v21 = vperm.slane %v426_v13, 2 }
  0x4e   : > { %820 = vmatpush.bf16.msrb.mxu2 %v3276_v49  ;;  %v3149_v49 = vor.u32 %v3397_v47, %v3148_v45  ;;  %v3389_v2 = vld [vmem:[#allocation7 + $0x30c] sm:$0xf0]  ;;  %v2972_v22 = vld [vmem:[#allocation7 + $0x1e0] sm:$0xf] }
  0x4f   : > { %833 = vmatpush.bf16.msrb.mxu3 %v3284_v56  ;;  %1733 = vmatpush.bf16.msrb.mxu0 %v2757_v62  ;;  %v2749_v56 = vor.u32 %v3297_v54, %v2748_v53  ;;  %v2732_v62 = vld [vmem:[#allocation7] sm:$0xf]  ;;  %v3117_v4 = vor.u32 %v3389_v2, %v3116_v0  ;;  %v3353_v23 = vld [vmem:[#allocation7 + $0x1ec] sm:$0xf0] }
  0x50   : > { %v2733_v1 = vor.u32 %v3293_v63, %v2732_v62  ;;  %v2956_v33 = vld [vmem:[#allocation7 + $0x1c0] sm:$0xf]  ;;  %v3349_v34 = vld [vmem:[#allocation7 + $0x1cc] sm:$0xf0] }
  0x51   : > { %795 = vmatpush.bf16.msrb.mxu1 %v3259_v55  ;;  %v3132_v55 = vld [vmem:[#allocation7 + $0x320] sm:$0xf]  ;;  %v3385_v38 = vld [vmem:[#allocation7 + $0x2ec] sm:$0xf0]  ;;  %v2957_v40 = vor.u32 %v3349_v34, %v2956_v33 }
  0x52   : > { %821 = vmatpush.bf16.msrb.mxu2 %v3275_v58  ;;  %v3304_v58 = vld [vmem:[#allocation7 + $0x6c] sm:$0xf]  ;;  %v3100_v37 = vld [vmem:[#allocation7 + $0x2e0] sm:$0xf]  ;;  %v3345_v45 = vld [vmem:[#allocation7 + $0x1ac] sm:$0xf0] }
  0x53   : > { %834 = vmatpush.bf16.msrb.mxu3 %v3283_v3  ;;  %1734 = vmatpush.bf16.msrb.mxu0 %v2741_v11  ;;  %v3300_v3 = vld [vmem:[#allocation7 + $0x4c] sm:$0xf]  ;;  %v2742_v11 = vld [vmem:[#allocation7 + $0x18] sm:$0xf0]  ;;  %v2940_v44 = vld [vmem:[#allocation7 + $0x1a0] sm:$0xf]  ;;  %v3101_v50 = vor.u32 %v3385_v38, %v3100_v37 }
  0x54   : > { %v2745_v12 = vor.u32 %v3292_v10, %v2742_v11  ;;  %v2924_v63 = vld [vmem:[#allocation7 + $0x180] sm:$0xf]  ;;  %v3341_v0 = vld [vmem:[#allocation7 + $0x18c] sm:$0xf0]  ;;  %v2814_v10 = vld [vmem:[#allocation7 + $0xb0] sm:$0xf0] }
  0x55   : > { %801 = vmatpush.bf16.msra.mxu1 %v3274_v57  ;;  %v3393_v57 = vld [vmem:[#allocation7 + $0x32c] sm:$0xf0]  ;;  %v3299_v38 = vld [vmem:[#allocation7 + $0x44] sm:$0xf] }
  0x56   : > { %1623 = vmatpush.bf16.msra.mxu2 %v2845_v59  ;;  %v2790_v59 = vld [vmem:[#allocation7 + $0x78] sm:$0xf0]  ;;  %v3133_v60 = vor.u32 %v3393_v57, %v3132_v55  ;;  %v3329_v33 = vld [vmem:[#allocation7 + $0x12c] sm:$0xf0] }
  0x57   : > { %1662 = vmatpush.bf16.msra.mxu3 %v3229_v7  ;;  %1779 = vmatpush.bf16.msra.mxu0 %v2857_v14  ;;  %v2793_v61 = vor.u32 %v3304_v58, %v2790_v59  ;;  %v3296_v7 = vld [vmem:[#allocation7 + $0x2c] sm:$0xf]  ;;  %v428_v14 = vperm.slane %v426_v13, 0  ;;  %v2941_v58 = vor.u32 %v3345_v45, %v2940_v44  ;;  %v3381_v59 = vld [vmem:[#allocation7 + $0x2cc] sm:$0xf0] }
  0x58   : > { %v3365_v37 = vld [vmem:[#allocation7 + $0x24c] sm:$0xf0]  ;;  %v3351_v45 = vld [vmem:[#allocation7 + $0x1e4] sm:$0xf] }
  0x59   : > { %802 = vmatpush.bf16.msra.mxu1 %v3273_v6  ;;  %v2777_v6 = vor.u32 %v3300_v3, %v2774_v5 }
  0x5a   : > { %1624 = vmatpush.bf16.msra.mxu2 %v2829_v8  ;;  %v2758_v8 = vld [vmem:[#allocation7 + $0x38] sm:$0xf0] }
  0x5b   : > { %1663 = vmatpush.bf16.msra.mxu3 %v3213_v18  ;;  %1780 = vmatpush.bf16.msra.mxu0 %v2841_v24  ;;  %v2761_v9 = vor.u32 %v3296_v7, %v2758_v8  ;;  %v431_v24 = vperm.slane %v426_v13, 3  ;;  %v2925_v7 = vor.u32 %v3341_v0, %v2924_v63  ;;  %v3377_v8 = vld [vmem:[#allocation7 + $0x2ac] sm:$0xf0]  ;;  %v3383_v63 = vld [vmem:[#allocation7 + $0x2e4] sm:$0xf] }
  0x5c   : > { %v3337_v13 = vld [vmem:[#allocation7 + $0x16c] sm:$0xf0]  ;;  %v3102_v0 = vld [vmem:[#allocation7 + $0x2f0] sm:$0xf0] }
  0x5d   : > { %803 = vmatpush.bf16.msra.mxu1 %v3272_v17 }
  0x5e   : > { %1625 = vmatpush.bf16.msra.mxu2 %v2813_v19 }
  0x5f   : > { %1664 = vmatpush.bf16.msra.mxu3 %v3197_v26  ;;  %1781 = vmatpush.bf16.msra.mxu0 %v2825_v41  ;;  %v3319_v41 = vld [vmem:[#allocation7 + $0xe4] sm:$0xf] }
  0x61   : > { %804 = vmatpush.bf16.msra.mxu1 %v3271_v25 }
  0x62   : > { %1626 = vmatpush.bf16.msra.mxu2 %v2797_v27  ;;  %v2973_v27 = vor.u32 %v3353_v23, %v2972_v22  ;;  %v2892_v23 = vld [vmem:[#allocation7 + $0x140] sm:$0xf] }
  0x63   : > { %1665 = vmatpush.bf16.msra.mxu3 %v3181_v31  ;;  %1782 = vmatpush.bf16.msra.mxu0 %v2809_v51 }
  0x65   : > { %805 = vmatpush.bf16.msra.mxu1 %v3270_v30 }
  0x66   : > { %1627 = vmatpush.bf16.msra.mxu2 %v2781_v35 }
  0x67   : > { %1666 = vmatpush.bf16.msra.mxu3 %v3165_v39  ;;  %1783 = vmatpush.bf16.msra.mxu0 %v2793_v61  ;;  %v2830_v61 = vld [vmem:[#allocation7 + $0xd0] sm:$0xf0] }
  0x69   : > { %806 = vmatpush.bf16.msra.mxu1 %v3269_v32 }
  0x6a   : > { %1628 = vmatpush.bf16.msra.mxu2 %v2765_v46 }
  0x6b   : > { %1667 = vmatpush.bf16.msra.mxu3 %v3149_v49  ;;  %1784 = vmatpush.bf16.msra.mxu0 %v2777_v6  ;;  %v3068_v6 = vld [vmem:[#allocation7 + $0x2a0] sm:$0xf] }
  0x6d   : > { %807 = vmatpush.bf16.msra.mxu1 %v3268_v42  ;;  %v2846_v42 = vld [vmem:[#allocation7 + $0xf0] sm:$0xf0] }
  0x6e   : > { %1629 = vmatpush.bf16.msra.mxu2 %v2749_v56  ;;  %v2849_v51 = vor.u32 %v3319_v41, %v2846_v42  ;;  %v2860_v41 = vld [vmem:[#allocation7 + $0x100] sm:$0xf]  ;;  %v3325_v42 = vld [vmem:[#allocation7 + $0x10c] sm:$0xf0] }
  0x6f   : > { %1668 = vmatpush.bf16.msra.mxu3 %v3133_v60  ;;  %1785 = vmatpush.bf16.msra.mxu0 %v2761_v9  ;;  %v3315_v60 = vld [vmem:[#allocation7 + $0xc4] sm:$0xf] }
  0x70   : > { %v2833_v5 = vor.u32 %v3315_v60, %v2830_v61  ;;  %v3311_v9 = vld [vmem:[#allocation7 + $0xa4] sm:$0xf]  ;;  %v3357_v60 = vld [vmem:[#allocation7 + $0x20c] sm:$0xf0] }
  0x71   : > { %808 = vmatpush.bf16.msra.mxu1 %v3267_v52  ;;  %v3084_v52 = vld [vmem:[#allocation7 + $0x2c0] sm:$0xf]  ;;  %v3291_v61 = vld [vmem:[#allocation7 + $0x4] sm:$0xf] }
  0x72   : > { %1630 = vmatpush.bf16.msra.mxu2 %v2733_v1 }
  0x73   : > { %1669 = vmatpush.bf16.msra.mxu3 %v3117_v4  ;;  %1786 = vmatpush.bf16.msra.mxu0 %v2745_v12  ;;  %v3085_v4 = vor.u32 %v3381_v59, %v3084_v52  ;;  %v2908_v12 = vld [vmem:[#allocation7 + $0x160] sm:$0xf] }
  0x74   : > { %v2988_v59 = vld [vmem:[#allocation7 + $0x200] sm:$0xf] }
  0xb1   : > { %v469_v16 = vpop.f32.mrf.mxu0  ;;  %v482_v18 = vpop.f32.mrf.mxu1 }
  0xb2   : > { %v470_v17 = vadd.f32 %v469_v16, %v428_v14  ;;  %v483_v19 = vadd.f32 %v482_v18, %v429_v15  ;;  %v3069_v14 = vor.u32 %v3377_v8, %v3068_v6  ;;  %v2817_v15 = vor.u32 %v3311_v9, %v2814_v10  ;;  %v3052_v16 = vld [vmem:[#allocation7 + $0x280] sm:$0xf]  ;;  %v3307_v18 = vld [vmem:[#allocation7 + $0x84] sm:$0xf]  ;;  %v2942_v9 = vld [vmem:[#allocation7 + $0x1b0] sm:$0xf0] }
  0xb3   : > { %v2989_v6 = vor.u32 %v3357_v60, %v2988_v59  ;;  %v3343_v8 = vld [vmem:[#allocation7 + $0x1a4] sm:$0xf]  ;;  %v3105_v10 = vor.u32 %v3383_v63, %v3102_v0  ;;  %v2980_v60 = vld [vmem:[#allocation7 + $0x1e8] sm:$0xf]  ;;  %v3006_v63 = vld [vmem:[#allocation7 + $0x230] sm:$0xf0] }
  0xb4   : > { %v4061_v20 = vpack.c.bf16 %v483_v19, %v470_v17  ;;  %v3373_v17 = vld [vmem:[#allocation7 + $0x28c] sm:$0xf0]  ;;  %v2798_v19 = vld [vmem:[#allocation7 + $0x90] sm:$0xf0]  ;;  %v3391_v0 = vld [vmem:[#allocation7 + $0x324] sm:$0xf] }
  0xb6   : > { %v584_v25 = vunpack.c.l.b16 %v4061_v20  ;;  %v2081_v28 = vrot.slane %v4061_v20, 2  ;;  %v585_v11 = vunpack.c.h.b16 %v4061_v20 }
  0xb8   : > { %v495_v26 = vpop.f32.mrf.mxu2  ;;  %v4065_v31 = vpack.c.b16 %v584_v25, %v584_v25  ;;  %v2095_v43 = vsel %vm2094_vm1, %v4061_v20, %v2081_v28  ;;  %v2087_v53 = vsel %vm2084_vm3, %v4061_v20, %v2081_v28  ;;  %v4086_v22 = vpack.c.b16 %v585_v11, %v585_v11  ;;  %v3303_v28 = vld [vmem:[#allocation7 + $0x64] sm:$0xf] }
  0xb9   : > { %v496_v29 = vadd.f32 %v495_v26, %v430_v21  ;;  %v508_v30 = vpop.f32.mrf.mxu3  ;;  %v471_v32 = vpop.f32.mrf.mxu0  ;;  %v2909_v21 = vor.u32 %v3337_v13, %v2908_v12  ;;  %v3053_v25 = vor.u32 %v3373_v17, %v3052_v16  ;;  %v2801_v20 = vor.u32 %v3307_v18, %v2798_v19  ;;  %v3036_v26 = vld [vmem:[#allocation7 + $0x260] sm:$0xf]  ;;  %v3379_v12 = vld [vmem:[#allocation7 + $0x2c4] sm:$0xf]  ;;  %v3086_v13 = vld [vmem:[#allocation7 + $0x2d0] sm:$0xf0] }
  0xba   : > { %v509_v35 = vadd.f32 %v508_v30, %v431_v24  ;;  %v484_v36 = vpop.f32.mrf.mxu1  ;;  %796 = vmatmul.bf16.vlgmr.msrb.gmra.mxu1 %v4065_v31  ;;  %1735 = vmatmul.bf16.vlgmr.msrb.gmra.mxu0 %v4065_v31  ;;  %v3333_v24 = vld [vmem:[#allocation7 + $0x14c] sm:$0xf0]  ;;  %v2876_v32 = vld [vmem:[#allocation7 + $0x120] sm:$0xf]  ;;  %v2945_v16 = vor.u32 %v3343_v8, %v2942_v9  ;;  %v3339_v17 = vld [vmem:[#allocation7 + $0x184] sm:$0xf]  ;;  %v3089_v19 = vor.u32 %v3379_v12, %v3086_v13 }
  0xbb   : > { %1636 = vmatpush.bf16.msrb.mxu1 %v2973_v27  ;;  %v3369_v27 = vld [vmem:[#allocation7 + $0x26c] sm:$0xf0]  ;;  %v2893_v30 = vor.u32 %v3333_v24, %v2892_v23  ;;  %v3020_v36 = vld [vmem:[#allocation7 + $0x240] sm:$0xf]  ;;  %v2926_v18 = vld [vmem:[#allocation7 + $0x190] sm:$0xf0] }
  0xbc   : > { %v513_v39 = vpack.c.bf16 %v509_v35, %v496_v29  ;;  %v2782_v29 = vld [vmem:[#allocation7 + $0x70] sm:$0xf0]  ;;  %v3037_v34 = vor.u32 %v3369_v27, %v3036_v26  ;;  %v3375_v23 = vld [vmem:[#allocation7 + $0x2a4] sm:$0xf]  ;;  %v2929_v26 = vor.u32 %v3339_v17, %v2926_v18  ;;  %v3350_v9 = vld [vmem:[#allocation7 + $0x1d4] sm:$0xf0] }
  0xbd   : > { %v2785_v35 = vor.u32 %v3303_v28, %v2782_v29  ;;  %v3070_v24 = vld [vmem:[#allocation7 + $0x2b0] sm:$0xf0]  ;;  %v3335_v27 = vld [vmem:[#allocation7 + $0x164] sm:$0xf]  ;;  %v3418_v17 = vld [vmem:[#allocation7 + $0x3f4] sm:$0xf0] }
  0xbe   : > { %v586_v46 = vunpack.c.l.b16 %v513_v39  ;;  %v587_v47 = vunpack.c.h.b16 %v513_v39  ;;  %v2082_v48 = vrot.slane %v513_v39, 4  ;;  %v2083_v49 = vrot.slane %v513_v39, 6  ;;  %v2766_v39 = vld [vmem:[#allocation7 + $0x50] sm:$0xf0]  ;;  %v3387_v12 = vld [vmem:[#allocation7 + $0x304] sm:$0xf] }
  0xbf   : > { %1637 = vmatpush.bf16.msrb.mxu1 %v2957_v40  ;;  %v2877_v40 = vor.u32 %v3329_v33, %v2876_v32  ;;  %v2769_v44 = vor.u32 %v3299_v38, %v2766_v39  ;;  %v2910_v28 = vld [vmem:[#allocation7 + $0x170] sm:$0xf0]  ;;  %v3073_v29 = vor.u32 %v3375_v23, %v3070_v24  ;;  %v3371_v32 = vld [vmem:[#allocation7 + $0x284] sm:$0xf] }
  0xc0   : > { %v4071_v54 = vpack.c.b16 %v586_v46, %v586_v46  ;;  %v4073_v55 = vpack.c.b16 %v587_v47, %v587_v47  ;;  %v2097_v56 = vsel %vm2096_vm2, %v2083_v49, %v2082_v48  ;;  %v497_v57 = vpop.f32.mrf.mxu2  ;;  %v2091_v1 = vsel %vm2088_vm4, %v2082_v48, %v2083_v49  ;;  %v2974_v46 = vld [vmem:[#allocation7 + $0x1f0] sm:$0xf0]  ;;  %v3004_v47 = vld [vmem:[#allocation7 + $0x220] sm:$0xf]  ;;  %v3361_v48 = vld [vmem:[#allocation7 + $0x22c] sm:$0xf0] }
  0xc1   : > { %v510_v62 = vpop.f32.mrf.mxu3  ;;  %v4078_v2 = vsel %vm2098_vm5, %v2095_v43, %v2097_v56  ;;  %v4083_v3 = vsel %vm1888_vm6, %v2087_v53, %v2091_v1  ;;  %v3021_v43 = vor.u32 %v3365_v37, %v3020_v36  ;;  %v3295_v49 = vld [vmem:[#allocation7 + $0x24] sm:$0xf]  ;;  %v2977_v52 = vor.u32 %v3351_v45, %v2974_v46  ;;  %v3054_v33 = vld [vmem:[#allocation7 + $0x290] sm:$0xf0] }
  0xc2   : > { %822 = vmatmul.bf16.vlgmr.msrb.gmra.mxu2 %v4071_v54  ;;  %835 = vmatmul.bf16.vlgmr.msrb.gmra.mxu3 %v4073_v55  ;;  %v3347_v53 = vld [vmem:[#allocation7 + $0x1c4] sm:$0xf]  ;;  %v3005_v56 = vor.u32 %v3361_v48, %v3004_v47  ;;  %v2734_v62 = vld [vmem:[#allocation7 + $0x10] sm:$0xf0]  ;;  %v2913_v36 = vor.u32 %v3335_v27, %v2910_v28  ;;  %v3057_v39 = vor.u32 %v3371_v32, %v3054_v33  ;;  %v3382_v27 = vld [vmem:[#allocation7 + $0x2d4] sm:$0xf0] }
  0xc3   : > { %1649 = vmatpush.bf16.msrb.mxu2 %v3101_v50  ;;  %1675 = vmatpush.bf16.msrb.mxu3 %v2849_v51  ;;  %v2750_v50 = vld [vmem:[#allocation7 + $0x30] sm:$0xf0]  ;;  %v2861_v51 = vor.u32 %v3325_v42, %v2860_v41  ;;  %v3415_v1 = vld [vmem:[#allocation7 + $0x3e4] sm:$0xf]  ;;  %v3220_v28 = vld [vmem:[#allocation7 + $0x3c8] sm:$0xf] }
  0xc4   : > { %1638 = vmatpush.bf16.msrb.mxu1 %v2941_v58  ;;  %v2753_v57 = vor.u32 %v3295_v49, %v2750_v50  ;;  %v2958_v58 = vld [vmem:[#allocation7 + $0x1d0] sm:$0xf0]  ;;  %v3331_v37 = vld [vmem:[#allocation7 + $0x144] sm:$0xf] }
  0xc5   : > { %v2894_v38 = vld [vmem:[#allocation7 + $0x150] sm:$0xf0]  ;;  %v3367_v41 = vld [vmem:[#allocation7 + $0x264] sm:$0xf] }
  0xc6   : > { %v3399_v42 = vld [vmem:[#allocation7 + $0x364] sm:$0xf]  ;;  %v2878_v46 = vld [vmem:[#allocation7 + $0x130] sm:$0xf0] }
  0xc7   : > { %1650 = vmatpush.bf16.msrb.mxu2 %v3085_v4  ;;  %1676 = vmatpush.bf16.msrb.mxu3 %v2833_v5  ;;  %v3230_v4 = vld [vmem:[#allocation7 + $0x3f0] sm:$0xf0]  ;;  %v2961_v5 = vor.u32 %v3347_v53, %v2958_v58  ;;  %v3327_v45 = vld [vmem:[#allocation7 + $0x124] sm:$0xf] }
  0xc8   : > { %1639 = vmatpush.bf16.msrb.mxu1 %v2925_v7  ;;  %v2737_v7 = vor.u32 %v3291_v61, %v2734_v62  ;;  %v3233_v11 = vor.u32 %v3415_v1, %v3230_v4  ;;  %v3363_v49 = vld [vmem:[#allocation7 + $0x244] sm:$0xf]  ;;  %v3022_v50 = vld [vmem:[#allocation7 + $0x250] sm:$0xf0]  ;;  %v2881_v53 = vor.u32 %v3327_v45, %v2878_v46  ;;  %v3354_v61 = vld [vmem:[#allocation7 + $0x1f4] sm:$0xf0] }
  0xc9   : > { %v3025_v58 = vor.u32 %v3363_v49, %v3022_v50  ;;  %v3359_v62 = vld [vmem:[#allocation7 + $0x224] sm:$0xf]  ;;  %v3134_v1 = vld [vmem:[#allocation7 + $0x330] sm:$0xf0]  ;;  %v3374_v45 = vld [vmem:[#allocation7 + $0x294] sm:$0xf0] }
  0xca   : > { %809 = vmatmul.bf16.vlgmr.msra.gmra.mxu1 %v4086_v22  ;;  %1787 = vmatmul.bf16.vlgmr.msra.gmra.mxu0 %v4065_v31  ;;  %v3137_v8 = vor.u32 %v3391_v0, %v3134_v1  ;;  %v3118_v13 = vld [vmem:[#allocation7 + $0x310] sm:$0xf0]  ;;  %v3188_v46 = vld [vmem:[#allocation7 + $0x388] sm:$0xf]  ;;  %v3366_v1 = vld [vmem:[#allocation7 + $0x254] sm:$0xf0] }
  0xcb   : > { %1651 = vmatpush.bf16.msrb.mxu2 %v3069_v14  ;;  %1677 = vmatpush.bf16.msrb.mxu3 %v2817_v15  ;;  %v3411_v14 = vld [vmem:[#allocation7 + $0x3c4] sm:$0xf]  ;;  %v3214_v15 = vld [vmem:[#allocation7 + $0x3d0] sm:$0xf0]  ;;  %v3028_v0 = vld [vmem:[#allocation7 + $0x248] sm:$0xf] }
  0xcc   : > { %1640 = vmatpush.bf16.msrb.mxu1 %v2909_v21  ;;  %v3217_v21 = vor.u32 %v3411_v14, %v3214_v15  ;;  %v3108_v14 = vld [vmem:[#allocation7 + $0x2e8] sm:$0xf]  ;;  %v3386_v15 = vld [vmem:[#allocation7 + $0x2f4] sm:$0xf0] }
  0xcd   : > { %v3109_v23 = vor.u32 %v3386_v15, %v3108_v14  ;;  %v3362_v14 = vld [vmem:[#allocation7 + $0x234] sm:$0xf0]  ;;  %v3140_v15 = vld [vmem:[#allocation7 + $0x328] sm:$0xf] }
  0xcf   : > { %1652 = vmatpush.bf16.msrb.mxu2 %v3053_v25  ;;  %1678 = vmatpush.bf16.msrb.mxu3 %v2801_v20  ;;  %v3407_v25 = vld [vmem:[#allocation7 + $0x3a4] sm:$0xf]  ;;  %v3198_v20 = vld [vmem:[#allocation7 + $0x3b0] sm:$0xf0] }
  0xd0   : > { %1641 = vmatpush.bf16.msrb.mxu1 %v2893_v30  ;;  %v3201_v30 = vor.u32 %v3407_v25, %v3198_v20  ;;  %v2948_v25 = vld [vmem:[#allocation7 + $0x1a8] sm:$0xf]  ;;  %v3346_v20 = vld [vmem:[#allocation7 + $0x1b4] sm:$0xf0] }
  0xd2   : > { %1631 = vmatmul.bf16.vlgmr.msra.gmra.mxu2 %v4065_v31  ;;  %1670 = vmatmul.bf16.vlgmr.msra.gmra.mxu3 %v4073_v55 }
  0xd3   : > { %1653 = vmatpush.bf16.msrb.mxu2 %v3037_v34  ;;  %1679 = vmatpush.bf16.msrb.mxu3 %v2785_v35  ;;  %v3403_v34 = vld [vmem:[#allocation7 + $0x384] sm:$0xf]  ;;  %v3182_v35 = vld [vmem:[#allocation7 + $0x390] sm:$0xf0] }
  0xd4   : > { %1642 = vmatpush.bf16.msrb.mxu1 %v2877_v40  ;;  %v3185_v40 = vor.u32 %v3403_v34, %v3182_v35  ;;  %v2932_v34 = vld [vmem:[#allocation7 + $0x188] sm:$0xf]  ;;  %v3342_v35 = vld [vmem:[#allocation7 + $0x194] sm:$0xf0] }
  0xd7   : > { %1654 = vmatpush.bf16.msrb.mxu2 %v3021_v43  ;;  %1680 = vmatpush.bf16.msrb.mxu3 %v2769_v44  ;;  %v3166_v43 = vld [vmem:[#allocation7 + $0x370] sm:$0xf0]  ;;  %v2897_v44 = vor.u32 %v3331_v37, %v2894_v38  ;;  %v3378_v37 = vld [vmem:[#allocation7 + $0x2b4] sm:$0xf0]  ;;  %v3204_v38 = vld [vmem:[#allocation7 + $0x3a8] sm:$0xf] }
  0xd8   : > { %1643 = vmatpush.bf16.msrb.mxu1 %v2861_v51  ;;  %v3169_v48 = vor.u32 %v3399_v42, %v3166_v43  ;;  %v3395_v51 = vld [vmem:[#allocation7 + $0x344] sm:$0xf]  ;;  %v2916_v42 = vld [vmem:[#allocation7 + $0x168] sm:$0xf]  ;;  %v3338_v43 = vld [vmem:[#allocation7 + $0x174] sm:$0xf0] }
  0xdb   : > { %1655 = vmatpush.bf16.msrb.mxu2 %v3005_v56  ;;  %1681 = vmatpush.bf16.msrb.mxu3 %v2753_v57  ;;  %v3323_v56 = vld [vmem:[#allocation7 + $0x104] sm:$0xf]  ;;  %v2862_v57 = vld [vmem:[#allocation7 + $0x110] sm:$0xf0] }
  0xdc   : > { %1688 = vmatpush.bf16.msra.mxu1 %v2977_v52  ;;  %v3150_v52 = vld [vmem:[#allocation7 + $0x350] sm:$0xf0]  ;;  %v2865_v4 = vor.u32 %v3323_v56, %v2862_v57  ;;  %v3370_v56 = vld [vmem:[#allocation7 + $0x274] sm:$0xf0]  ;;  %v3172_v57 = vld [vmem:[#allocation7 + $0x368] sm:$0xf] }
  0xdd   : > { %1644 = vmatmul.bf16.vlgmr.msrb.gmra.mxu1 %v4086_v22  ;;  %v3153_v59 = vor.u32 %v3395_v51, %v3150_v52  ;;  %v2900_v51 = vld [vmem:[#allocation7 + $0x148] sm:$0xf]  ;;  %v3334_v52 = vld [vmem:[#allocation7 + $0x154] sm:$0xf0] }
  0xdf   : > { %1656 = vmatpush.bf16.msrb.mxu2 %v2989_v6  ;;  %1682 = vmatpush.bf16.msrb.mxu3 %v2737_v7  ;;  %v2964_v6 = vld [vmem:[#allocation7 + $0x1c8] sm:$0xf]  ;;  %v3009_v7 = vor.u32 %v3359_v62, %v3006_v63  ;;  %v3330_v63 = vld [vmem:[#allocation7 + $0x134] sm:$0xf0] }
  0xe0   : > { %1689 = vmatpush.bf16.msra.mxu1 %v2961_v5  ;;  %v2981_v5 = vor.u32 %v3354_v61, %v2980_v60  ;;  %v2965_v18 = vor.u32 %v3350_v9, %v2964_v6  ;;  %v2884_v62 = vld [vmem:[#allocation7 + $0x128] sm:$0xf] }
  0xe1   : > { %v2885_v6 = vor.u32 %v3330_v63, %v2884_v62  ;;  %v2868_v9 = vld [vmem:[#allocation7 + $0x108] sm:$0xf]  ;;  %v3190_v62 = vld [vmem:[#allocation7 + $0x398] sm:$0xf0] }
  0xe2   : > { %1657 = vmatmul.bf16.vlgmr.msrb.gmra.mxu2 %v4071_v54  ;;  %1683 = vmatmul.bf16.vlgmr.msrb.gmra.mxu3 %v4065_v31  ;;  %v3038_v31 = vld [vmem:[#allocation7 + $0x270] sm:$0xf0] }
  0xe3   : > { %1701 = vmatpush.bf16.msra.mxu2 %v3105_v10  ;;  %1714 = vmatpush.bf16.msra.mxu3 %v3233_v11  ;;  %v3041_v47 = vor.u32 %v3367_v41, %v3038_v31  ;;  %v3355_v10 = vld [vmem:[#allocation7 + $0x204] sm:$0xf]  ;;  %v2990_v11 = vld [vmem:[#allocation7 + $0x210] sm:$0xf0] }
  0xe4   : > { %1690 = vmatpush.bf16.msra.mxu1 %v2945_v16  ;;  %v3236_v16 = vld [vmem:[#allocation7 + $0x3e8] sm:$0xf] }
  0xe5   : > { %v3237_v24 = vor.u32 %v3418_v17, %v3236_v16  ;;  %v3394_v16 = vld [vmem:[#allocation7 + $0x334] sm:$0xf0] }
  0xe7   : > { %1702 = vmatpush.bf16.msra.mxu2 %v3089_v19  ;;  %1715 = vmatpush.bf16.msra.mxu3 %v3217_v21  ;;  %v2993_v19 = vor.u32 %v3355_v10, %v2990_v11  ;;  %v3121_v21 = vor.u32 %v3387_v12, %v3118_v13  ;;  %v3326_v10 = vld [vmem:[#allocation7 + $0x114] sm:$0xf0]  ;;  %v3352_v11 = vld [vmem:[#allocation7 + $0x1ec] sm:$0xf]  ;;  %v2982_v12 = vld [vmem:[#allocation7 + $0x1f8] sm:$0xf0] }
  0xe8   : > { %1691 = vmatpush.bf16.msra.mxu1 %v2929_v26  ;;  %v3092_v26 = vld [vmem:[#allocation7 + $0x2c8] sm:$0xf]  ;;  %v2869_v17 = vor.u32 %v3326_v10, %v2868_v9  ;;  %v3174_v9 = vld [vmem:[#allocation7 + $0x378] sm:$0xf0] }
  0xe9   : > { %v3093_v32 = vor.u32 %v3382_v27, %v3092_v26  ;;  %v3012_v13 = vld [vmem:[#allocation7 + $0x228] sm:$0xf]  ;;  %v3390_v27 = vld [vmem:[#allocation7 + $0x314] sm:$0xf0] }
  0xea   : > { %v3124_v26 = vld [vmem:[#allocation7 + $0x308] sm:$0xf] }
  0xeb   : > { %1703 = vmatpush.bf16.msra.mxu2 %v3073_v29  ;;  %1716 = vmatpush.bf16.msra.mxu3 %v3201_v30  ;;  %v3414_v29 = vld [vmem:[#allocation7 + $0x3d4] sm:$0xf0]  ;;  %v2949_v30 = vor.u32 %v3346_v20, %v2948_v25  ;;  %v2996_v25 = vld [vmem:[#allocation7 + $0x208] sm:$0xf] }
  0xec   : > { %1692 = vmatpush.bf16.msra.mxu1 %v2913_v36  ;;  %v3221_v33 = vor.u32 %v3414_v29, %v3220_v28  ;;  %v3076_v36 = vld [vmem:[#allocation7 + $0x2a8] sm:$0xf]  ;;  %v3358_v20 = vld [vmem:[#allocation7 + $0x214] sm:$0xf0]  ;;  %v3384_v28 = vld [vmem:[#allocation7 + $0x2ec] sm:$0xf] }
  0xed   : > { %v3077_v41 = vor.u32 %v3378_v37, %v3076_v36  ;;  %v3110_v29 = vld [vmem:[#allocation7 + $0x2f8] sm:$0xf0]  ;;  %v3344_v37 = vld [vmem:[#allocation7 + $0x1ac] sm:$0xf] }
  0xee   : > { %v3113_v36 = vor.u32 %v3384_v28, %v3110_v29  ;;  %v3142_v28 = vld [vmem:[#allocation7 + $0x338] sm:$0xf0] }
  0xef   : > { %1704 = vmatpush.bf16.msra.mxu2 %v3057_v39  ;;  %1717 = vmatpush.bf16.msra.mxu3 %v3185_v40  ;;  %v3410_v39 = vld [vmem:[#allocation7 + $0x3b4] sm:$0xf0]  ;;  %v2933_v40 = vor.u32 %v3342_v35, %v2932_v34  ;;  %v2997_v34 = vor.u32 %v3358_v20, %v2996_v25  ;;  %v3125_v35 = vor.u32 %v3390_v27, %v3124_v26  ;;  %v3360_v20 = vld [vmem:[#allocation7 + $0x22c] sm:$0xf]  ;;  %v3014_v26 = vld [vmem:[#allocation7 + $0x238] sm:$0xf0] }
  0xf0   : > { %1693 = vmatpush.bf16.msra.mxu1 %v2897_v44  ;;  %v3205_v31 = vor.u32 %v3410_v39, %v3204_v38  ;;  %v3060_v44 = vld [vmem:[#allocation7 + $0x288] sm:$0xf]  ;;  %v2950_v38 = vld [vmem:[#allocation7 + $0x1b8] sm:$0xf0]  ;;  %v3392_v27 = vld [vmem:[#allocation7 + $0x32c] sm:$0xf] }
  0xf1   : > { %v3061_v49 = vor.u32 %v3374_v45, %v3060_v44  ;;  %v3340_v45 = vld [vmem:[#allocation7 + $0x18c] sm:$0xf] }
  0xf3   : > { %1705 = vmatpush.bf16.msra.mxu2 %v3041_v47  ;;  %1718 = vmatpush.bf16.msra.mxu3 %v3169_v48  ;;  %v3406_v47 = vld [vmem:[#allocation7 + $0x394] sm:$0xf0]  ;;  %v2917_v48 = vor.u32 %v3338_v43, %v2916_v42  ;;  %v3222_v42 = vld [vmem:[#allocation7 + $0x3d8] sm:$0xf0]  ;;  %v2953_v43 = vor.u32 %v3344_v37, %v2950_v38 }
  0xf4   : > { %1694 = vmatpush.bf16.msra.mxu1 %v2881_v53  ;;  %v3189_v50 = vor.u32 %v3406_v47, %v3188_v46  ;;  %v3044_v53 = vld [vmem:[#allocation7 + $0x268] sm:$0xf]  ;;  %v2934_v46 = vld [vmem:[#allocation7 + $0x198] sm:$0xf0] }
  0xf5   : > { %v3045_v60 = vor.u32 %v3370_v56, %v3044_v53  ;;  %v3336_v56 = vld [vmem:[#allocation7 + $0x16c] sm:$0xf] }
  0xf7   : > { %1706 = vmatpush.bf16.msra.mxu2 %v3025_v58  ;;  %1719 = vmatpush.bf16.msra.mxu3 %v3153_v59  ;;  %v3402_v58 = vld [vmem:[#allocation7 + $0x374] sm:$0xf0]  ;;  %v2901_v59 = vor.u32 %v3334_v52, %v2900_v51  ;;  %v3206_v51 = vld [vmem:[#allocation7 + $0x3b8] sm:$0xf0]  ;;  %v2937_v52 = vor.u32 %v3340_v45, %v2934_v46 }
  0xf8   : > { %1695 = vmatpush.bf16.msra.mxu1 %v2865_v4  ;;  %v3173_v61 = vor.u32 %v3402_v58, %v3172_v57  ;;  %v3156_v4 = vld [vmem:[#allocation7 + $0x348] sm:$0xf]  ;;  %v2918_v57 = vld [vmem:[#allocation7 + $0x178] sm:$0xf0] }
  0xf9   : > { %v2921_v63 = vor.u32 %v3336_v56, %v2918_v57 }
  0xfb   : > { %1707 = vmatpush.bf16.msra.mxu2 %v3009_v7  ;;  %1720 = vmatpush.bf16.msra.mxu3 %v3137_v8  ;;  %v3029_v7 = vor.u32 %v3366_v1, %v3028_v0  ;;  %v3332_v1 = vld [vmem:[#allocation7 + $0x14c] sm:$0xf] }
  0xfc   : > { %1740 = vmatpush.bf16.msrb.mxu1 %v2981_v5  ;;  %v3398_v5 = vld [vmem:[#allocation7 + $0x354] sm:$0xf0] }
  0xfd   : > { %1696 = vmatmul.bf16.vlgmr.msra.gmra.mxu1 %v4086_v22  ;;  %v3157_v8 = vor.u32 %v3398_v5, %v3156_v4  ;;  %v2902_v4 = vld [vmem:[#allocation7 + $0x158] sm:$0xf0] }
  0xfe   : > { %v2905_v10 = vor.u32 %v3332_v1, %v2902_v4 }
  0xff   : > { %1708 = vmatpush.bf16.msra.mxu2 %v2993_v19  ;;  %1721 = vmatpush.bf16.msra.mxu3 %v3121_v21  ;;  %v3013_v19 = vor.u32 %v3362_v14, %v3012_v13  ;;  %v3348_v21 = vld [vmem:[#allocation7 + $0x1cc] sm:$0xf]  ;;  %v2886_v13 = vld [vmem:[#allocation7 + $0x138] sm:$0xf0] }
 0x100   : > { %1741 = vmatpush.bf16.msrb.mxu1 %v2965_v18  ;;  %v2985_v18 = vor.u32 %v3352_v11, %v2982_v12  ;;  %v3328_v12 = vld [vmem:[#allocation7 + $0x12c] sm:$0xf] }
 0x102   : > { %1709 = vmatmul.bf16.vlgmr.msra.gmra.mxu2 %v4071_v54  ;;  %1722 = vmatmul.bf16.vlgmr.msra.gmra.mxu3 %v4073_v55 }
 0x103   : > { %1753 = vmatpush.bf16.msrb.mxu2 %v3109_v23  ;;  %1766 = vmatpush.bf16.msrb.mxu3 %v3237_v24  ;;  %v2966_v23 = vld [vmem:[#allocation7 + $0x1d8] sm:$0xf0]  ;;  %v3141_v24 = vor.u32 %v3394_v16, %v3140_v15  ;;  %v3364_v15 = vld [vmem:[#allocation7 + $0x24c] sm:$0xf] }
 0x104   : > { %1742 = vmatpush.bf16.msrb.mxu1 %v2949_v30  ;;  %v3416_v30 = vld [vmem:[#allocation7 + $0x3ec] sm:$0xf]  ;;  %v3030_v16 = vld [vmem:[#allocation7 + $0x258] sm:$0xf0] }
 0x107   : > { %1754 = vmatpush.bf16.msrb.mxu2 %v3093_v32  ;;  %1767 = vmatpush.bf16.msrb.mxu3 %v3221_v33  ;;  %v3238_v32 = vld [vmem:[#allocation7 + $0x3f8] sm:$0xf0]  ;;  %v2969_v33 = vor.u32 %v3348_v21, %v2966_v23  ;;  %v3033_v21 = vor.u32 %v3364_v15, %v3030_v16  ;;  %v3324_v23 = vld [vmem:[#allocation7 + $0x10c] sm:$0xf] }
 0x108   : > { %1743 = vmatpush.bf16.msrb.mxu1 %v2933_v40  ;;  %v3241_v39 = vor.u32 %v3416_v30, %v3238_v32  ;;  %v3380_v40 = vld [vmem:[#allocation7 + $0x2cc] sm:$0xf]  ;;  %v3017_v30 = vor.u32 %v3360_v20, %v3014_v26  ;;  %v3145_v32 = vor.u32 %v3392_v27, %v3142_v28 }
 0x10b   : > { %1755 = vmatpush.bf16.msrb.mxu2 %v3077_v41  ;;  %1768 = vmatpush.bf16.msrb.mxu3 %v3205_v31  ;;  %v3094_v41 = vld [vmem:[#allocation7 + $0x2d8] sm:$0xf0]  ;;  %v3412_v31 = vld [vmem:[#allocation7 + $0x3cc] sm:$0xf] }
 0x10c   : > { %1744 = vmatpush.bf16.msrb.mxu1 %v2917_v48  ;;  %v3097_v44 = vor.u32 %v3380_v40, %v3094_v41  ;;  %v3225_v47 = vor.u32 %v3412_v31, %v3222_v42  ;;  %v3376_v48 = vld [vmem:[#allocation7 + $0x2ac] sm:$0xf]  ;;  %v1962_v41 = vlaneseq }
 0x10e   : > { %v1963_v31 = vshrl.u32 %v1962_v41, 7 }
 0x10f   : > { %1756 = vmatpush.bf16.msrb.mxu2 %v3061_v49  ;;  %1769 = vmatpush.bf16.msrb.mxu3 %v3189_v50  ;;  %v3078_v49 = vld [vmem:[#allocation7 + $0x2b8] sm:$0xf0]  ;;  %v3408_v50 = vld [vmem:[#allocation7 + $0x3ac] sm:$0xf] }
 0x110   : > { %1745 = vmatpush.bf16.msrb.mxu1 %v2901_v59  ;;  %v3081_v53 = vor.u32 %v3376_v48, %v3078_v49  ;;  %v3209_v58 = vor.u32 %v3408_v50, %v3206_v51  ;;  %v3372_v59 = vld [vmem:[#allocation7 + $0x28c] sm:$0xf]  ;;  %3557 = vset.pattern.permute.xlu2 %v1963_v31 }
 0x111   : > { %3556 = vset.pattern.permute.xlu1 %v1963_v31  ;;  %3558 = vset.pattern.permute.xlu0 %v1963_v31 }
 0x113   : > { %1757 = vmatpush.bf16.msrb.mxu2 %v3045_v60  ;;  %1770 = vmatpush.bf16.msrb.mxu3 %v3173_v61  ;;  %v3062_v60 = vld [vmem:[#allocation7 + $0x298] sm:$0xf0]  ;;  %v3404_v61 = vld [vmem:[#allocation7 + $0x38c] sm:$0xf] }
 0x114   : > { %1746 = vmatpush.bf16.msrb.mxu1 %v2885_v6  ;;  %v3065_v0 = vor.u32 %v3372_v59, %v3062_v60  ;;  %v3193_v5 = vor.u32 %v3404_v61, %v3190_v62  ;;  %v3368_v6 = vld [vmem:[#allocation7 + $0x26c] sm:$0xf] }
 0x117   : > { %1758 = vmatpush.bf16.msrb.mxu2 %v3029_v7  ;;  %1771 = vmatpush.bf16.msrb.mxu3 %v3157_v8  ;;  %v3046_v7 = vld [vmem:[#allocation7 + $0x278] sm:$0xf0]  ;;  %v3400_v8 = vld [vmem:[#allocation7 + $0x36c] sm:$0xf] }
 0x118   : > { %1747 = vmatpush.bf16.msrb.mxu1 %v2869_v17  ;;  %v3049_v11 = vor.u32 %v3368_v6, %v3046_v7  ;;  %v3177_v14 = vor.u32 %v3400_v8, %v3174_v9  ;;  %v3396_v17 = vld [vmem:[#allocation7 + $0x34c] sm:$0xf] }
 0x11b   : > { %1759 = vmatpush.bf16.msrb.mxu2 %v3013_v19  ;;  %1772 = vmatpush.bf16.msrb.mxu3 %v3141_v24  ;;  %v2889_v19 = vor.u32 %v3328_v12, %v2886_v13  ;;  %v2870_v24 = vld [vmem:[#allocation7 + $0x118] sm:$0xf0] }
 0x11c   : > { %1792 = vmatpush.bf16.msra.mxu1 %v2985_v18  ;;  %v3158_v18 = vld [vmem:[#allocation7 + $0x358] sm:$0xf0]  ;;  %v2873_v29 = vor.u32 %v3324_v23, %v2870_v24 }
 0x11d   : > { %1748 = vmatmul.bf16.vlgmr.msrb.gmra.mxu1 %v4086_v22  ;;  %v3161_v25 = vor.u32 %v3396_v17, %v3158_v18 }
 0x11f   : > { %1760 = vmatpush.bf16.msrb.mxu2 %v2997_v34  ;;  %1773 = vmatpush.bf16.msrb.mxu3 %v3125_v35  ;;  %v2998_v34 = vld [vmem:[#allocation7 + $0x218] sm:$0xf0]  ;;  %v3388_v35 = vld [vmem:[#allocation7 + $0x30c] sm:$0xf] }
 0x120   : > { %1793 = vmatpush.bf16.msra.mxu1 %v2969_v33  ;;  %v3356_v33 = vld [vmem:[#allocation7 + $0x20c] sm:$0xf] }
 0x121   : > { %v3001_v37 = vor.u32 %v3356_v33, %v2998_v34 }
 0x122   : > { %1761 = vmatmul.bf16.vlgmr.msrb.gmra.mxu2 %v4071_v54  ;;  %1774 = vmatmul.bf16.vlgmr.msrb.gmra.mxu3 %v4073_v55 }
 0x123   : > { %1805 = vmatpush.bf16.msra.mxu2 %v3113_v36  ;;  %1818 = vmatpush.bf16.msra.mxu3 %v3241_v39  ;;  %v3126_v36 = vld [vmem:[#allocation7 + $0x318] sm:$0xf0] }
 0x124   : > { %1794 = vmatpush.bf16.msra.mxu1 %v2953_v43  ;;  %v3129_v38 = vor.u32 %v3388_v35, %v3126_v36 }
 0x127   : > { %1806 = vmatpush.bf16.msra.mxu2 %v3097_v44  ;;  %1819 = vmatpush.bf16.msra.mxu3 %v3225_v47  ;;  %v3559_v44 = vld [vmem:[%s4438_s4] ss:$0 sm:$0xff] }
 0x128   : > { %1795 = vmatpush.bf16.msra.mxu1 %v2937_v52 }
 0x12b   : > { %1807 = vmatpush.bf16.msra.mxu2 %v3081_v53  ;;  %1820 = vmatpush.bf16.msra.mxu3 %v3209_v58  ;;  %v973_v58 = vld [vmem:[%s4440_s6] sm:$0xf] }
 0x12c   : > { %1796 = vmatpush.bf16.msra.mxu1 %v2921_v63  ;;  %v975_v59 = vperm.slane %v973_v58, 0  ;;  %v976_v17 = vperm.slane %v973_v58, 1  ;;  %v977_v28 = vperm.slane %v973_v58, 2 }
 0x12f   : > { %1808 = vmatpush.bf16.msra.mxu2 %v3065_v0  ;;  %1821 = vmatpush.bf16.msra.mxu3 %v3193_v5 }
 0x130   : > { %1797 = vmatpush.bf16.msra.mxu1 %v2905_v10 }
 0x133   : > { %1809 = vmatpush.bf16.msra.mxu2 %v3049_v11  ;;  %1822 = vmatpush.bf16.msra.mxu3 %v3177_v14 }
 0x134   : > { %1798 = vmatpush.bf16.msra.mxu1 %v2889_v19 }
 0x137   : > { %1810 = vmatpush.bf16.msra.mxu2 %v3033_v21  ;;  %1823 = vmatpush.bf16.msra.mxu3 %v3161_v25  ;;  %v797_v39 = vpop.f32.mrf.mxu1  ;;  %v1736_v40 = vpop.f32.mrf.mxu0 }
 0x138   : > { %1799 = vmatpush.bf16.msra.mxu1 %v2873_v29  ;;  %v798_v46 = vadd.f32 %v3559_v44, %v797_v39  ;;  %v1737_v29 = vadd.f32 %v1736_v40, %v977_v28  ;;  %v978_v44 = vperm.slane %v973_v58, 3 }
 0x13b   : > { %1811 = vmatpush.bf16.msra.mxu2 %v3017_v30  ;;  %1824 = vmatpush.bf16.msra.mxu3 %v3145_v32 }
 0x13c   : > { %1800 = vmatmul.bf16.vlgmr.msra.gmra.mxu1 %v4086_v22 }
 0x13f   : > { %1812 = vmatpush.bf16.msra.mxu2 %v3001_v37  ;;  %1825 = vmatpush.bf16.msra.mxu3 %v3129_v38  ;;  %v799_v42 = vpop.f32.mrf.mxu1  ;;  %v1738_v43 = vpop.f32.mrf.mxu0 }
 0x142   : > { %1813 = vmatmul.bf16.vlgmr.msra.gmra.mxu2 %v4071_v54  ;;  %1826 = vmatmul.bf16.vlgmr.msra.gmra.mxu3 %v4073_v55 }
 0x145   : > { %v823_v22 = vpop.f32.mrf.mxu2  ;;  %v836_v45 = vpop.f32.mrf.mxu3 }
 0x147   : > { %v810_v47 = vpop.f32.mrf.mxu1  ;;  %v4107_v48 = vpop.f32.mrf.mxu0 }
 0x148   : > { %v811_v54 = vadd.f32 %v810_v47, %v798_v46  ;;  %v1789_v46 = vadd.f32 %v4107_v48, %v978_v44 }
 0x14a   : > { %v824_v49 = vadd.f32 %v823_v22, %v811_v54  ;;  %v3802_v22 = vmov 1983009808  }
 0x14c   : > { %v837_v51 = vadd.f32 %v836_v45, %v824_v49  ;;  %v1837_v45 = vunpack.c.l.s4 %v3802_v22 }
 0x14d   : > { %v825_v55 = vpop.f32.mrf.mxu2  ;;  %v838_v50 = vpop.f32.mrf.mxu3 }
 0x14e   : > { %v840_v52 = vsub.f32 0.0, %v837_v51  ;;  %v1838_v54 = vunpack.c.0.s8 %v1837_v45 }
 0x14f   : > { %v812_v53 = vpop.f32.mrf.mxu1  ;;  %v1790_v56 = vpop.f32.mrf.mxu0 }
 0x150   : > { %v841_v57 = vmul.f32 1.442695, %v840_v52  ;;  %v3803_v53 = vmov 1934713408  }
 0x151   : > { %v1861_v56 = vunpack.c.l.s4 %v3803_v53 }
 0x152   : > { %3560 = vpow2.f32 %v841_v57 }
 0x155   : > { %v1632_v60 = vpop.f32.mrf.mxu2  ;;  %v1671_v61 = vpop.f32.mrf.mxu3 }
 0x156   : > { %v1633_v62 = vadd.f32 %v1632_v60, %v975_v59 }
 0x158   : > { %v3561_v0 = vpop.eup %3560 }
 0x159   : > { %v843_v4 = vadd.f32 1.0, %v3561_v0 }
 0x15a   : > { %v1645_v63 = vpop.f32.mrf.mxu1 }
 0x15b   : > { %v1646_v1 = vadd.f32 %v1645_v63, %v1633_v62  ;;  %3562 = vrcp.f32 %v843_v4  ;;  %v1862_v63 = vunpack.c.0.s8 %v1861_v56 }
 0x15d   : > { %v1634_v5 = vpop.f32.mrf.mxu2  ;;  %v1673_v6 = vpop.f32.mrf.mxu3 }
 0x161   : > { %v4112_v8 = vpop.eup %3562 }
 0x162   : > { %v1647_v7 = vpop.f32.mrf.mxu1  ;;  %v1996_v9 = vperm.slane %v4112_v8, 5  ;;  %v1989_v10 = vperm.slane %v4112_v8, 4 }
 0x164   : > { %2001 = vperm.xlu2 %3557, %v1996_v9   ;;  %1994 = vperm.xlu1 %3556, %v1989_v10  }
 0x165   : > { %v1658_v11 = vpop.f32.mrf.mxu2  ;;  %v1684_v13 = vpop.f32.mrf.mxu3 }
 0x166   : > { %v1659_v12 = vadd.f32 %v1658_v11, %v1646_v1  ;;  %v1685_v18 = vadd.f32 %v1684_v13, %v976_v17 }
 0x168   : > { %v1672_v14 = vadd.f32 %v1671_v61, %v1659_v12 }
 0x16a   : > { %v1834_v36 = vrot.slane %v1672_v14, 4 }
 0x16d   : > { %v1660_v15 = vpop.f32.mrf.mxu2  ;;  %v1686_v16 = vpop.f32.mrf.mxu3 }
 0x17a   : > { %v1697_v19 = vpop.f32.mrf.mxu1 }
 0x17b   : > { %v1698_v21 = vadd.f32 %v1697_v19, %v1685_v18 }
 0x182   : > { %v1699_v23 = vpop.f32.mrf.mxu1 }
 0x185   : > { %v1710_v24 = vpop.f32.mrf.mxu2  ;;  %v1723_v25 = vpop.f32.mrf.mxu3 }
 0x186   : > { %v1711_v40 = vadd.f32 %v1710_v24, %v1698_v21 }
 0x188   : > { %v1724_v49 = vadd.f32 %v1723_v25, %v1711_v40 }
 0x18a   : > { %v1846_v59 = vrot.slane %v1724_v49, 4 }
 0x18d   : > { %v1712_v20 = vpop.f32.mrf.mxu2  ;;  %v1725_v26 = vpop.f32.mrf.mxu3 }
 0x19a   : > { %v1749_v27 = vpop.f32.mrf.mxu1 }
 0x19b   : > { %v1750_v32 = vadd.f32 %v1749_v27, %v1737_v29 }
 0x1a2   : > { %v1751_v30 = vpop.f32.mrf.mxu1 }
 0x1a5   : > { %v1762_v33 = vpop.f32.mrf.mxu2  ;;  %v1775_v35 = vpop.f32.mrf.mxu3 }
 0x1a6   : > { %v1763_v34 = vadd.f32 %v1762_v33, %v1750_v32 }
 0x1a8   : > { %v1776_v37 = vadd.f32 %v1775_v35, %v1763_v34 }
 0x1aa   : > { %v1831_v38 = vrot.slane %v1776_v37, 4  ;;  %v1835_v39 = vsel %vm1832_vm7, %v1776_v37, %v1834_v36 }
 0x1ab   : > { %v1843_v57 = vperm.slane %v1835_v39, %v1838_v54 }
 0x1ac   : > { %v1833_v41 = vsel %vm1832_vm7, %v1831_v38, %v1672_v14 }
 0x1ad   : > { %v1764_v31 = vpop.f32.mrf.mxu2  ;;  %v1777_v42 = vpop.f32.mrf.mxu3  ;;  %v1839_v61 = vperm.slane %v1833_v41, %v1838_v54  ;;  %v1870_v0 = vrot.slane %v1843_v57, 4 }
 0x1af   : > { %v1858_v4 = vrot.slane %v1839_v61, 4 }
 0x1b9   : > { %v1801_v43 = vpop.f32.mrf.mxu1 }
 0x1ba   : > { %v1802_v55 = vadd.f32 %v1801_v43, %v1789_v46 }
 0x1be   : > { %v4142_v38 = vpop.permute.xlu2 %2001 }
 0x1c1   : > { %v1803_v47 = vpop.f32.mrf.mxu1 }
 0x1c5   : > { %v1814_v50 = vpop.f32.mrf.mxu2  ;;  %v1827_v52 = vpop.f32.mrf.mxu3 }
 0x1c6   : > { %v1815_v51 = vadd.f32 %v1814_v50, %v1802_v55 }
 0x1c8   : > { %v1828_v60 = vadd.f32 %v1827_v52, %v1815_v51 }
 0x1ca   : > { %v1844_v62 = vrot.slane %v1828_v60, 4  ;;  %v1847_v58 = vsel %vm1832_vm7, %v1828_v60, %v1846_v59 }
 0x1cb   : > { %v1855_v1 = vperm.slane %v1847_v58, %v1838_v54 }
 0x1cc   : > { %v1845_v48 = vsel %vm1832_vm7, %v1844_v62, %v1724_v49 }
 0x1cd   : > { %v1851_v5 = vperm.slane %v1845_v48, %v1838_v54  ;;  %v1868_v6 = vrot.slane %v1855_v1, 4  ;;  %v1816_v7 = vpop.f32.mrf.mxu2  ;;  %v1871_v9 = vsel %vm1832_vm7, %v1855_v1, %v1870_v0  ;;  %v1829_v10 = vpop.f32.mrf.mxu3 }
 0x1ce   : > { %v1879_v11 = vperm.slane %v1871_v9, %v1862_v63  ;;  %v1961_v10 = vperm.slane %v4112_v8, 0 }
 0x1cf   : > { %v1856_v12 = vrot.slane %v1851_v5, 4  ;;  %v1869_v13 = vsel %vm1832_vm7, %v1868_v6, %v1843_v57  ;;  %v1859_v14 = vsel %vm1832_vm7, %v1851_v5, %v1858_v4 }
 0x1d0   : > { %v1907_v15 = vsel %vm1888_vm6, %v1879_v11, -inf  ;;  %v1875_v16 = vperm.slane %v1869_v13, %v1862_v63  ;;  %v1886_v18 = vrot.slane %v1879_v11, 4  ;;  %v1867_v25 = vperm.slane %v1859_v14, %v1862_v63 }
 0x1d1   : > { %1908 = vmax.xlane.f32.xlu1 %v1907_v15  ;;  %v1857_v17 = vsel %vm1832_vm7, %v1856_v12, %v1839_v61  ;;  %v1975_v12 = vperm.slane %v4112_v8, 2  ;;  %v2010_v13 = vperm.slane %v4112_v8, 7  ;;  %v2003_v14 = vperm.slane %v4112_v8, 6 }
 0x1d2   : > { %v1901_v19 = vsel %vm1888_vm6, %v1875_v16, -inf  ;;  %v1863_v21 = vperm.slane %v1857_v17, %v1862_v63  ;;  %v1887_v24 = vsel %vm1832_vm7, 0.0, %v1886_v18  ;;  %v1882_v28 = vrot.slane %v1867_v25, 4 }
 0x1d3   : > { %1902 = vmax.xlane.f32.xlu0 %v1901_v19  ;;  %v1910_v26 = vsel %vm1888_vm6, %v1887_v24, -inf  ;;  %v1895_v29 = vsel %vm1888_vm6, %v1867_v25, -inf  ;;  %v1884_v30 = vrot.slane %v1875_v16, 4  ;;  %v1968_v15 = vperm.slane %v4112_v8, 1 }
 0x1d4   : > { %v1889_v23 = vsel %vm1888_vm6, %v1863_v21, -inf  ;;  %v1880_v20 = vrot.slane %v1863_v21, 4  ;;  %v1883_v33 = vsel %vm1832_vm7, 0.0, %v1882_v28  ;;  %v1982_v17 = vperm.slane %v4112_v8, 3 }
 0x1d5   : > { %1890 = vmax.xlane.f32.xlu2 %v1889_v23  ;;  %v1885_v34 = vsel %vm1832_vm7, 0.0, %v1884_v30  ;;  %v1898_v35 = vsel %vm1888_vm6, %v1883_v33, -inf }
 0x1d6   : > { %v4131_v27 = vsel %vm1832_vm7, 0.0, %v1880_v20  ;;  %v1904_v36 = vsel %vm1888_vm6, %v1885_v34, -inf  ;;  %v4140_v37 = vpop.permute.xlu1 %1994  ;;  %v2103_v20 = vunpack.c.h.b16 %v4083_v3 }
 0x1d7   : > { %v1892_v32 = vsel %vm1888_vm6, %v4131_v27, -inf }
 0x1d9   : > { %1911 = vmax.xlane.f32.xlu1 %v1910_v26 }
 0x1db   : > { %1896 = vmax.xlane.f32.xlu0 %v1895_v29 }
 0x1dd   : > { %1893 = vmax.xlane.f32.xlu2 %v1892_v32 }
 0x1e1   : > { %1899 = vmax.xlane.f32.xlu1 %v1898_v35 }
 0x1e3   : > { %1905 = vmax.xlane.f32.xlu0 %v1904_v36  ;;  %v2101_v36 = vrot.slane %v4078_v2, 2 }
 0x244   : > { %v1909_v39 = vpop.xlane.xlu1 %1908 }
 0x245   : > { %v1919_v41 = vsub.f32 %v1879_v11, %v1909_v39 }
 0x246   : > { %v1903_v31 = vpop.xlane.xlu0 %1902 }
 0x247   : > { %v1933_v42 = vmul.f32 1.442695, %v1919_v41  ;;  %v1917_v43 = vsub.f32 %v1875_v16, %v1903_v31  ;;  %v2110_v31 = vunpack.c.h.b16 %v2101_v36 }
 0x248   : > { %v1891_v44 = vpop.xlane.xlu2 %1890 }
 0x249   : > { %3564 = vpow2.f32 %v1933_v42  ;;  %v1929_v22 = vmul.f32 1.442695, %v1917_v43  ;;  %v1913_v45 = vsub.f32 %v1863_v21, %v1891_v44 }
 0x24b   : > { %3566 = vpow2.f32 %v1929_v22  ;;  %v1921_v40 = vmul.f32 1.442695, %v1913_v45 }
 0x24c   : > { %v1912_v46 = vpop.xlane.xlu1 %1911 }
 0x24d   : > { %3568 = vpow2.f32 %v1921_v40  ;;  %v1920_v51 = vsub.f32 %v1887_v24, %v1912_v46 }
 0x24e   : > { %v1897_v47 = vpop.xlane.xlu0 %1896 }
 0x24f   : > { %v4144_v54 = vpop.eup %3564  ;;  %v1915_v49 = vsub.f32 %v1867_v25, %v1897_v47  ;;  %v1935_v59 = vmul.f32 1.442695, %v1920_v51  ;;  %v2102_v25 = vunpack.c.l.b16 %v4083_v3  ;;  %v2109_v3 = vunpack.c.l.b16 %v2101_v36 }
 0x250   : > { %v1955_v55 = vsel %vm1888_vm6, %v4144_v54, 0.0  ;;  %v1894_v16 = vpop.xlane.xlu2 %1893 }
 0x251   : > { %v3567_v50 = vpop.eup %3566  ;;  %v1925_v52 = vmul.f32 1.442695, %v1915_v49  ;;  %1956 = vadd.xlane.f32.xlu1 %v1955_v55  ;;  %v1914_v18 = vsub.f32 %v4131_v27, %v1894_v16  ;;  %v2104_v26 = vpack.i.b16 %v2103_v20, %v2102_v25  ;;  %v2111_v43 = vpack.i.b16 %v2110_v31, %v2109_v3 }
 0x252   : > { %v1949_v53 = vsel %vm1888_vm6, %v3567_v50, 0.0 }
 0x253   : > { %v4149_v56 = vpop.eup %3568  ;;  %3570 = vpow2.f32 %v1925_v52  ;;  %1950 = vadd.xlane.f32.xlu2 %v1949_v53  ;;  %v1923_v19 = vmul.f32 1.442695, %v1914_v18  ;;  %v2105_v32 = vunpack.c.l.b16 %v2104_v26  ;;  %v2112_v55 = vunpack.c.l.b16 %v2111_v43 }
 0x254   : > { %v1937_v57 = vsel %vm1888_vm6, %v4149_v56, 0.0  ;;  %v1900_v60 = vpop.xlane.xlu1 %1899  ;;  %3572 = vpow2.f32 %v1935_v59 }
 0x255   : > { %1938 = vadd.xlane.f32.xlu0 %v1937_v57  ;;  %v1916_v63 = vsub.f32 %v1883_v33, %v1900_v60  ;;  %v2106_v33 = vunpack.c.h.b16 %v2104_v26 }
 0x256   : > { %v1906_v61 = vpop.xlane.xlu0 %1905 }
 0x257   : > { %v1918_v62 = vsub.f32 %v1885_v34, %v1906_v61  ;;  %v1927_v48 = vmul.f32 1.442695, %v1916_v63  ;;  %v2107_v35 = vpack.i.b16 %v2106_v33, %v2105_v32 }
 0x259   : > { %v4153_v58 = vpop.eup %3570  ;;  %v1931_v0 = vmul.f32 1.442695, %v1918_v62 }
 0x25a   : > { %v1943_v1 = vsel %vm1888_vm6, %v4153_v58, 0.0  ;;  %v4157_v4 = vpop.eup %3572 }
 0x25b   : > { %3574 = vpow2.f32 %v1931_v0  ;;  %1944 = vadd.xlane.f32.xlu2 %v1943_v1  ;;  %v1958_v7 = vsel %vm1888_vm6, %v4157_v4, 0.0 }
 0x25c   : > { %3576 = vpow2.f32 %v1927_v48 }
 0x25d   : > { %3578 = vpow2.f32 %v1923_v19 }
 0x261   : > { %v4159_v5 = vpop.eup %3574 }
 0x262   : > { %v1952_v6 = vsel %vm1888_vm6, %v4159_v5, 0.0  ;;  %v4165_v9 = vpop.eup %3576 }
 0x263   : > { %1953 = vadd.xlane.f32.xlu0 %v1952_v6  ;;  %1959 = vadd.xlane.f32.xlu2 %v1958_v7  ;;  %v1946_v11 = vsel %vm1888_vm6, %v4165_v9, 0.0  ;;  %v4176_v21 = vpop.eup %3578 }
 0x264   : > { %v1940_v23 = vsel %vm1888_vm6, %v4176_v21, 0.0 }
 0x26a   : > { %1966 = vperm.xlu1 %3556, %v1961_v10  }
 0x26b   : > { %1947 = vadd.xlane.f32.xlu0 %v1946_v11 }
 0x272   : > { %1980 = vperm.xlu1 %3556, %v1975_v12  }
 0x27b   : > { %2015 = vperm.xlu2 %3557, %v2010_v13  }
 0x27f   : > { %2008 = vperm.xlu0 %3558, %v2003_v14  }
 0x283   : > { %1973 = vperm.xlu2 %3557, %v1968_v15  }
 0x28b   : > { %1987 = vperm.xlu2 %3557, %v1982_v17  }
 0x29c   : > { %1941 = vadd.xlane.f32.xlu1 %v1940_v23 }
 0x2c4   : > { %v1957_v34 = vpop.xlane.xlu1 %1956 }
 0x2c6   : > { %v1951_v24 = vpop.xlane.xlu2 %1950 }
 0x2c7   : > { %3580 = vrcp.f32 %v1951_v24 }
 0x2c8   : > { %v1939_v27 = vpop.xlane.xlu0 %1938 }
 0x2c9   : > { %3582 = vrcp.f32 %v1939_v27 }
 0x2cd   : > { %v3581_v28 = vpop.eup %3580 }
 0x2ce   : > { %v2029_v8 = vmul.f32 %v3581_v28, %v4140_v37  ;;  %v1945_v29 = vpop.xlane.xlu2 %1944 }
 0x2cf   : > { %v3583_v42 = vpop.eup %3582 }
 0x2d0   : > { %v2037_v30 = vmul.f32 %v3567_v50, %v2029_v8  ;;  %v2113_v50 = vunpack.c.h.b16 %v2111_v43 }
 0x2d2   : > { %2057 = vst [vmem:[#allocation1 + $0x20] ss:$2 sm:$0xff] %v2037_v30  ;;  %v2114_v57 = vpack.i.b16 %v2113_v50, %v2112_v55  ;;  %v2120_v6 = vpack.c.bf16 %v2037_v30, %v2037_v30  ;;  %v2244_v50 = vld [vmem:[%s4441_s7 + $0x18] sm:$0xff] }
 0x2d6   : > { %v1954_v39 = vpop.xlane.xlu0 %1953  ;;  %v1960_v41 = vpop.xlane.xlu2 %1959  ;;  %2124 = vxpose.xlu1.c.b16.start [1/2] (short) %v2107_v35, 128 }
 0x2d7   : > { %3584 = vrcp.f32 %v1954_v39 }
 0x2d8   : > { %3586 = vrcp.f32 %v1960_v41 }
 0x2d9   : > { %3588 = vrcp.f32 %v1945_v29 }
 0x2dc   : > { %v1967_v37 = vpop.permute.xlu1 %1966 }
 0x2dd   : > { %v3585_v44 = vpop.eup %3584  ;;  %v2025_v22 = vmul.f32 %v3583_v42, %v1967_v37  ;;  %v2241_v42 = vld [vmem:[%s4441_s7] sm:$0xff] }
 0x2de   : > { %v3587_v45 = vpop.eup %3586  ;;  %v2030_v40 = vmul.f32 %v3585_v44, %v4142_v38  ;;  %v2016_v46 = vpop.permute.xlu2 %2015 }
 0x2df   : > { %v2033_v2 = vmul.f32 %v4149_v56, %v2025_v22  ;;  %v2032_v47 = vmul.f32 %v3587_v45, %v2016_v46  ;;  %v3589_v52 = vpop.eup %3588  ;;  %v1948_v59 = vpop.xlane.xlu0 %1947  ;;  %v2242_v22 = vld [vmem:[%s4441_s7 + $0x8] sm:$0xff] }
 0x2e0   : > { %v2038_v49 = vmul.f32 %v4159_v5, %v2030_v40  ;;  %3590 = vrcp.f32 %v1948_v59 }
 0x2e1   : > { %2049 = vst [vmem:[#allocation1] ss:$2 sm:$0xff] %v2033_v2  ;;  %v2040_v51 = vmul.f32 %v4157_v4, %v2032_v47  ;;  %3592 = vrcp.f32 %v1957_v34  ;;  %v2116_v23 = vpack.c.bf16 %v2033_v2, %v2033_v2  ;;  %v2243_v2 = vld [vmem:[%s4441_s7 + $0x10] sm:$0xff] }
 0x2e2   : > { %2059 = vst [vmem:[#allocation1 + $0x21] ss:$2 sm:$0xff] %v2038_v49  ;;  %v2121_v7 = vpack.c.bf16 %v2038_v49, %v2038_v49 }
 0x2e3   : > { %2063 = vst [vmem:[#allocation1 + $0x31] ss:$2 sm:$0xff] %v2040_v51  ;;  %v2123_v12 = vpack.c.bf16 %v2040_v51, %v2040_v51 }
 0x2e4   : > { %v1981_v53 = vpop.permute.xlu1 %1980 }
 0x2e5   : > { %v2027_v60 = vmul.f32 %v3589_v52, %v1981_v53 }
 0x2e6   : > { %v1974_v61 = vpop.permute.xlu2 %1973  ;;  %2125 = vxpose.xlu1.c.b16.end [2/2] (short) %v2114_v57, 128  ;;  %v3591_v56 = vpop.eup %3590  ;;  %v2245_v57 = vld [vmem:[%s4441_s7 + $0x20] sm:$0xff] }
 0x2e7   : > { %v2035_v38 = vmul.f32 %v4153_v58, %v2027_v60  ;;  %v3593_v0 = vpop.eup %3592 }
 0x2e9   : > { %2053 = vst [vmem:[#allocation1 + $0x10] ss:$2 sm:$0xff] %v2035_v38  ;;  %v2066_v10 = vld.sshfl [vmem:[#allocation1 + $0x20] sm:$0xff pattern:$0x75316420]  ;;  %v2118_v25 = vpack.c.bf16 %v2035_v38, %v2035_v38 }
 0x2ee   : > { %v1988_v62 = vpop.permute.xlu2 %1987 }
 0x2ef   : > { %v2028_v63 = vmul.f32 %v3591_v56, %v1988_v62 }
 0x2f1   : > { %v2036_v1 = vmul.f32 %v4165_v9, %v2028_v63  ;;  %v2009_v48 = vpop.permute.xlu0 %2008 }
 0x2f2   : > { %v2031_v4 = vmul.f32 %v3593_v0, %v2009_v48 }
 0x2f3   : > { %2055 = vst [vmem:[#allocation1 + $0x11] ss:$2 sm:$0xff] %v2036_v1  ;;  %v2119_v17 = vpack.c.bf16 %v2036_v1, %v2036_v1 }
 0x2f4   : > { %v2039_v5 = vmul.f32 %v4144_v54, %v2031_v4  ;;  %v2246_v4 = vld [vmem:[%s4441_s7 + $0x28] sm:$0xff] }
 0x2f6   : > { %2061 = vst [vmem:[#allocation1 + $0x30] ss:$2 sm:$0xff] %v2039_v5  ;;  %v2122_v58 = vpack.c.bf16 %v2039_v5, %v2039_v5 }
 0x2fa   : > { %v2065_v18 = vld.sshfl [vmem:[#allocation1 + $0x10] sm:$0xff pattern:$0x75316420] }
 0x2fd   : > { %v2067_v11 = vld.sshfl [vmem:[#allocation1 + $0x30] sm:$0xff pattern:$0x75316420] }
 0x2fe   : > { %2153 = vst [vmem:[#allocation1 + $0x20] ss:$4 sm:$0xff] %v2120_v6  ;;  %v2247_v6 = vld [vmem:[%s4441_s7 + $0x30] sm:$0xff] }
 0x2ff   : > { %2156 = vst [vmem:[#allocation1 + $0x21] ss:$4 sm:$0xff] %v2121_v7 }
 0x300   : > { %2159 = vst [vmem:[#allocation1 + $0x22] ss:$4 sm:$0xff] %v2122_v58  ;;  %v2248_v58 = vld [vmem:[%s4441_s7 + $0x38] sm:$0xff] }
 0x301   : > { %2162 = vst [vmem:[#allocation1 + $0x23] ss:$4 sm:$0xff] %v2123_v12 }
 0x308   : > { %v2164_v13 = vld.sshfl [vmem:[#allocation1 + $0x20] sm:$0xff pattern:$0x73625140] }
 0x309   : > { %2198 = vmatpush.bf16.msrb.mxu0 %v2164_v13 }
 0x30f   : > { %v1942_v14 = vpop.xlane.xlu1 %1941 }
 0x310   : > { %3594 = vrcp.f32 %v1942_v14 }
 0x316   : > { %v3595_v9 = vpop.eup %3594 }
 0x317   : > { %v2026_v15 = vmul.f32 %v3595_v9, %v1974_v61 }
 0x319   : > { %v2034_v16 = vmul.f32 %v4176_v21, %v2026_v15 }
 0x31b   : > { %2051 = vst [vmem:[#allocation1 + $0x1] ss:$2 sm:$0xff] %v2034_v16  ;;  %v2117_v54 = vpack.c.bf16 %v2034_v16, %v2034_v16  ;;  %v2249_v16 = vld [vmem:[%s4441_s7 + $0x40] sm:$0xff] }
 0x322   : > { %v2064_v19 = vld.sshfl [vmem:[#allocation1] sm:$0xff pattern:$0x75316420] }
 0x323   : > { %v2072_v24 = vadd.f32 %v2065_v18, %v2064_v19  ;;  %2144 = vst [vmem:[#allocation1 + $0x1] ss:$4 sm:$0xff] %v2117_v54 }
 0x324   : > { %2150 = vst [vmem:[#allocation1 + $0x3] ss:$4 sm:$0xff] %v2119_v17 }
 0x325   : > { %v2073_v20 = vadd.f32 %v2072_v24, %v2066_v10  ;;  %2141 = vst [vmem:[#allocation1] ss:$4 sm:$0xff] %v2116_v23  ;;  %v2250_v23 = vld [vmem:[%s4441_s7 + $0x48] sm:$0xff] }
 0x326   : > { %2147 = vst [vmem:[#allocation1 + $0x2] ss:$4 sm:$0xff] %v2118_v25 }
 0x327   : > { %v2074_v26 = vadd.f32 %v2073_v20, %v2067_v11 }
 0x329   : > { %v2075_v34 = vrot.slane %v2074_v26, 4 }
 0x32b   : > { %v2076_v35 = vadd.f32 %v2075_v34, %v2074_v26 }
 0x32d   : > { %v2163_v28 = vld.sshfl [vmem:[#allocation1] sm:$0xff pattern:$0x73625140]  ;;  %v2077_v36 = vrot.slane %v2076_v35, 2 }
 0x32e   : > { %2199 = vmatpush.bf16.msrb.mxu0 %v2163_v28  ;;  %v2251_v28 = vld [vmem:[%s4441_s7 + $0x50] sm:$0xff] }
 0x32f   : > { %v2078_v41 = vadd.f32 %v2077_v36, %v2076_v35 }
 0x331   : > { %v2079_v3 = vrot.slane %v2078_v41, 1 }
 0x333   : > { %v4200_v31 = vadd.f32 %v2079_v3, %v2078_v41 }
 0x335   : > { %v2257_v37 = vmul.f32 %v2241_v42, %v4200_v31  ;;  %v2258_v45 = vmul.f32 %v2242_v22, %v4200_v31  ;;  %v2259_v47 = vmul.f32 %v2243_v2, %v4200_v31  ;;  %v2260_v51 = vmul.f32 %v2244_v50, %v4200_v31 }
 0x336   : > { %v2261_v59 = vmul.f32 %v2245_v57, %v4200_v31  ;;  %v2262_v11 = vmul.f32 %v2246_v4, %v4200_v31  ;;  %v2263_v15 = vmul.f32 %v2247_v6, %v4200_v31  ;;  %v2264_v19 = vmul.f32 %v2248_v58, %v4200_v31 }
 0x337   : > { %v2265_v26 = vmul.f32 %v2249_v16, %v4200_v31  ;;  %v2267_v36 = vmul.f32 %v2251_v28, %v4200_v31 }
 0x382   : > { %v2132_v8 = vpop.trf.xlu1 }
 0x383   : > { %3242 = vmatmul.msk.bf16.vlgmr.msrb.gmra.mxu0 %vm2167_vm8, %v2132_v8 }
 0x392   : > { %v2133_v21 = vpop.trf.xlu1 }
 0x393   : > { %3243 = vmatmul.msk.bf16.gmra.mxu0 %vm2167_vm8, %v2133_v21 }
 0x3a2   : > { %v2134_v27 = vpop.trf.xlu1 }
 0x3a3   : > { %3244 = vmatmul.msk.bf16.gmra.mxu0 %vm2167_vm8, %v2134_v27 }
 0x3b2   : > { %v2135_v29 = vpop.trf.xlu1 }
 0x3b3   : > { %3245 = vmatmul.msk.bf16.gmra.mxu0 %vm2167_vm8, %v2135_v29  ;;  %v2266_v29 = vmul.f32 %v2250_v23, %v4200_v31 }
 0x3c2   : > { %v2136_v30 = vpop.trf.xlu1 }
 0x3c3   : > { %3246 = vmatmul.msk.bf16.gmra.mxu0 %vm2167_vm8, %v2136_v30  ;;  %v2252_v30 = vld [vmem:[%s4441_s7 + $0x58] sm:$0xff] }
 0x3d2   : > { %v2137_v32 = vpop.trf.xlu1 }
 0x3d3   : > { %3247 = vmatmul.msk.bf16.gmra.mxu0 %vm2167_vm8, %v2137_v32 }
 0x3e2   : > { %v2138_v33 = vpop.trf.xlu1 }
 0x3e3   : > { %3248 = vmatmul.msk.bf16.gmra.mxu0 %vm2167_vm8, %v2138_v33 }
 0x3f2   : > { %v2139_v39 = vpop.trf.xlu1 }
 0x3f3   : > { %3249 = vmatmul.msk.bf16.gmra.mxu0 %vm2167_vm8, %v2139_v39  ;;  %v2253_v39 = vld [vmem:[%s4441_s7 + $0x60] sm:$0xff] }
 0x3f4   : > { %v2269_v2 = vmul.f32 %v2253_v39, %v4200_v31 }
 0x400   : > { %v2201_v43 = vpop.f32.mrf.mxu0 }
 0x401   : > { %v4206_v44 = vsub.f32 %v2201_v43, %v2257_v37  ;;  %v2268_v37 = vmul.f32 %v2252_v30, %v4200_v31  ;;  %v2254_v43 = vld [vmem:[%s4441_s7 + $0x68] sm:$0xff] }
 0x403   : > { %v2289_v7 = vmul.f32 %v4206_v44, %v4206_v44 }
 0x408   : > { %v2203_v40 = vpop.f32.mrf.mxu0 }
 0x409   : > { %v4212_v46 = vsub.f32 %v2203_v40, %v2258_v45 }
 0x40b   : > { %v2290_v5 = vmul.f32 %v4212_v46, %v4212_v46 }
 0x40d   : > { %v2305_v13 = vadd.f32 %v2290_v5, %v2289_v7 }
 0x410   : > { %v2206_v49 = vpop.f32.mrf.mxu0 }
 0x411   : > { %v4218_v55 = vsub.f32 %v2206_v49, %v2259_v47  ;;  %v2255_v47 = vld [vmem:[%s4441_s7 + $0x70] sm:$0xff] }
 0x413   : > { %v2291_v10 = vmul.f32 %v4218_v55, %v4218_v55 }
 0x415   : > { %v2306_v54 = vadd.f32 %v2305_v13, %v2291_v10 }
 0x418   : > { %v2208_v52 = vpop.f32.mrf.mxu0 }
 0x419   : > { %v4224_v53 = vsub.f32 %v2208_v52, %v2260_v51  ;;  %v2270_v52 = vmul.f32 %v2254_v43, %v4200_v31  ;;  %v2354_v43 = vld [vmem:[%s4442_s8 + $0x8] sm:$0xff] }
 0x41b   : > { %v2292_v14 = vmul.f32 %v4224_v53, %v4224_v53 }
 0x41d   : > { %v2307_v24 = vadd.f32 %v2306_v54, %v2292_v14 }
 0x420   : > { %v2211_v60 = vpop.f32.mrf.mxu0 }
 0x421   : > { %v4230_v61 = vsub.f32 %v2211_v60, %v2261_v59 }
 0x423   : > { %v2293_v17 = vmul.f32 %v4230_v61, %v4230_v61 }
 0x425   : > { %v2308_v8 = vadd.f32 %v2307_v24, %v2293_v17 }
 0x428   : > { %v2213_v38 = vpop.f32.mrf.mxu0 }
 0x429   : > { %v4250_v9 = vsub.f32 %v2213_v38, %v2262_v11 }
 0x42b   : > { %v2294_v25 = vmul.f32 %v4250_v9, %v4250_v9 }
 0x42d   : > { %v2309_v33 = vadd.f32 %v2308_v8, %v2294_v25 }
 0x430   : > { %v2216_v56 = vpop.f32.mrf.mxu0 }
 0x431   : > { %v4258_v18 = vsub.f32 %v2216_v56, %v2263_v15  ;;  %v2271_v56 = vmul.f32 %v2255_v47, %v4200_v31  ;;  %v2356_v47 = vld [vmem:[%s4442_s8 + $0x18] sm:$0xff] }
 0x433   : > { %v2295_v21 = vmul.f32 %v4258_v18, %v4258_v18 }
 0x435   : > { %v2310_v41 = vadd.f32 %v2309_v33, %v2295_v21  ;;  %v2399_v33 = vld [vmem:[#allocation8 + $0x70] sm:$0xff] }
 0x438   : > { %v2218_v62 = vpop.f32.mrf.mxu0 }
 0x439   : > { %v4266_v20 = vsub.f32 %v2218_v62, %v2264_v19 }
 0x43b   : > { %v2296_v34 = vmul.f32 %v4266_v20, %v4266_v20 }
 0x43d   : > { %v2311_v22 = vadd.f32 %v2310_v41, %v2296_v34  ;;  %v2400_v34 = vld [vmem:[#allocation8 + $0x78] sm:$0xff] }
 0x440   : > { %v2221_v63 = vpop.f32.mrf.mxu0 }
 0x441   : > { %v4274_v27 = vsub.f32 %v2221_v63, %v2265_v26 }
 0x443   : > { %v2297_v3 = vmul.f32 %v4274_v27, %v4274_v27 }
 0x445   : > { %v2312_v49 = vadd.f32 %v2311_v22, %v2297_v3  ;;  %v2355_v22 = vld [vmem:[%s4442_s8 + $0x10] sm:$0xff] }
 0x448   : > { %v2223_v0 = vpop.f32.mrf.mxu0 }
 0x449   : > { %v4282_v35 = vsub.f32 %v2223_v0, %v2266_v29  ;;  %v2367_v29 = vld [vmem:[%s4442_s8 + $0x70] sm:$0xff] }
 0x44b   : > { %v2298_v45 = vmul.f32 %v4282_v35, %v4282_v35 }
 0x44d   : > { %v2313_v59 = vadd.f32 %v2312_v49, %v2298_v45  ;;  %v2357_v49 = vld [vmem:[%s4442_s8 + $0x20] sm:$0xff] }
 0x450   : > { %v2226_v1 = vpop.f32.mrf.mxu0 }
 0x451   : > { %v4290_v42 = vsub.f32 %v2226_v1, %v2267_v36  ;;  %v2256_v1 = vld [vmem:[%s4441_s7 + $0x78] sm:$0xff] }
 0x452   : > { %v2272_v7 = vmul.f32 %v2256_v1, %v4200_v31 }
 0x453   : > { %v2299_v50 = vmul.f32 %v4290_v42, %v4290_v42 }
 0x455   : > { %v2314_v62 = vadd.f32 %v2313_v59, %v2299_v50  ;;  %v2358_v50 = vld [vmem:[%s4442_s8 + $0x28] sm:$0xff]  ;;  %v2361_v59 = vld [vmem:[%s4442_s8 + $0x40] sm:$0xff] }
 0x458   : > { %v2228_v48 = vpop.f32.mrf.mxu0 }
 0x459   : > { %v4298_v40 = vsub.f32 %v2228_v48, %v2268_v37  ;;  %v2353_v37 = vld [vmem:[%s4442_s8] sm:$0xff] }
 0x45b   : > { %v2300_v60 = vmul.f32 %v4298_v40, %v4298_v40 }
 0x45d   : > { %v2315_v48 = vadd.f32 %v2314_v62, %v2300_v60  ;;  %v2362_v62 = vld [vmem:[%s4442_s8 + $0x48] sm:$0xff] }
 0x460   : > { %v2231_v12 = vpop.f32.mrf.mxu0 }
 0x461   : > { %v4306_v51 = vsub.f32 %v2231_v12, %v2269_v2 }
 0x463   : > { %v2301_v63 = vmul.f32 %v4306_v51, %v4306_v51 }
 0x465   : > { %v2316_v5 = vadd.f32 %v2315_v48, %v2301_v63  ;;  %v2363_v63 = vld [vmem:[%s4442_s8 + $0x50] sm:$0xff]  ;;  %v2366_v48 = vld [vmem:[%s4442_s8 + $0x68] sm:$0xff] }
 0x468   : > { %v2233_v32 = vpop.f32.mrf.mxu0 }
 0x469   : > { %v4311_v38 = vsub.f32 %v2233_v32, %v2270_v52  ;;  %v2368_v32 = vld [vmem:[%s4442_s8 + $0x78] sm:$0xff]  ;;  %v2359_v52 = vld [vmem:[%s4442_s8 + $0x30] sm:$0xff] }
 0x46b   : > { %v2302_v4 = vmul.f32 %v4311_v38, %v4311_v38 }
 0x46d   : > { %v2317_v11 = vadd.f32 %v2316_v5, %v2302_v4  ;;  %v2385_v4 = vld [vmem:[#allocation8] sm:$0xff] }
 0x470   : > { %v2236_v57 = vpop.f32.mrf.mxu0 }
 0x471   : > { %v2287_v0 = vsub.f32 %v2236_v57, %v2271_v56  ;;  %v2360_v57 = vld [vmem:[%s4442_s8 + $0x38] sm:$0xff] }
 0x473   : > { %v2303_v6 = vmul.f32 %v2287_v0, %v2287_v0 }
 0x475   : > { %v2318_v12 = vadd.f32 %v2317_v11, %v2303_v6  ;;  %v2386_v11 = vld [vmem:[#allocation8 + $0x8] sm:$0xff] }
 0x478   : > { %v2238_v10 = vpop.f32.mrf.mxu0 }
 0x479   : > { %v2288_v58 = vsub.f32 %v2238_v10, %v2272_v7 }
 0x47b   : > { %v2304_v13 = vmul.f32 %v2288_v58, %v2288_v58 }
 0x47d   : > { %v2319_v14 = vadd.f32 %v2318_v12, %v2304_v13  ;;  %v2388_v12 = vld [vmem:[#allocation8 + $0x18] sm:$0xff] }
 0x47f   : > { %v2320_v15 = vrot.slane %v2319_v14, 4 }
 0x481   : > { %v2321_v16 = vadd.f32 %v2320_v15, %v2319_v14  ;;  %v2389_v15 = vld [vmem:[#allocation8 + $0x20] sm:$0xff] }
 0x483   : > { %v2322_v54 = vrot.slane %v2321_v16, 2 }
 0x485   : > { %v2323_v17 = vadd.f32 %v2322_v54, %v2321_v16  ;;  %v2390_v16 = vld [vmem:[#allocation8 + $0x28] sm:$0xff]  ;;  %v2391_v54 = vld [vmem:[#allocation8 + $0x30] sm:$0xff] }
 0x487   : > { %v2324_v19 = vrot.slane %v2323_v17, 1 }
 0x489   : > { %v2325_v23 = vadd.f32 %v2324_v19, %v2323_v17 }
 0x48b   : > { %v2326_v24 = vmax.f32 %v2325_v23, 1e-24 }
 0x48d   : > { %3596 = vrsqrt.f32 %v2326_v24  ;;  %vm2333_vm10 = vweird.f32 %v2326_v24 }
 0x493   : > { %v3597_v25 = vpop.eup %3596 }
 0x494   : > { %v2328_v26 = vmul.f32 %v3597_v25, %v2326_v24  ;;  %vm2334_vm9 = vweird.f32 %v3597_v25 }
 0x495   : > { %vm2335_vm11 = vmor %vm2333_vm10, %vm2334_vm9 }
 0x496   : > { %v2329_v28 = vmul.f32 %v3597_v25, %v2328_v26  ;;  %v2393_v26 = vld [vmem:[#allocation8 + $0x40] sm:$0xff] }
 0x498   : > { %v2330_v8 = vmul.f32 0.5, %v2329_v28  ;;  %v2394_v28 = vld [vmem:[#allocation8 + $0x48] sm:$0xff] }
 0x49a   : > { %v2331_v31 = vsub.f32 1.5, %v2330_v8 }
 0x49c   : > { %v2332_v21 = vmul.f32 %v3597_v25, %v2331_v31 }
 0x49e   : > { %v2336_v30 = vsel %vm2335_vm11, %v3597_v25, %v2332_v21  ;;  %v2392_v25 = vld [vmem:[#allocation8 + $0x38] sm:$0xff] }
 0x49f   : > { %v2351_v36 = vmul.f32 %v2336_v30, %v2287_v0  ;;  %v2352_v39 = vmul.f32 %v2336_v30, %v2288_v58  ;;  %v2337_v41 = vmul.f32 %v2336_v30, %v4206_v44  ;;  %v2338_v3 = vmul.f32 %v2336_v30, %v4212_v46  ;;  %v2364_v0 = vld [vmem:[%s4442_s8 + $0x58] sm:$0xff] }
 0x4a0   : > { %v2339_v45 = vmul.f32 %v2336_v30, %v4218_v55  ;;  %v2340_v2 = vmul.f32 %v2336_v30, %v4224_v53  ;;  %v2341_v44 = vmul.f32 %v2336_v30, %v4230_v61  ;;  %v2342_v46 = vmul.f32 %v2336_v30, %v4250_v9  ;;  %v2387_v58 = vld [vmem:[#allocation8 + $0x10] sm:$0xff] }
 0x4a1   : > { %v2383_v55 = vmul.f32 %v2367_v29, %v2351_v36  ;;  %v2384_v53 = vmul.f32 %v2368_v32, %v2352_v39  ;;  %v2343_v61 = vmul.f32 %v2336_v30, %v4258_v18  ;;  %v2344_v9 = vmul.f32 %v2336_v30, %v4266_v20  ;;  %v2395_v29 = vld [vmem:[#allocation8 + $0x50] sm:$0xff]  ;;  %v2397_v32 = vld [vmem:[#allocation8 + $0x60] sm:$0xff] }
 0x4a2   : > { %v2345_v60 = vmul.f32 %v2336_v30, %v4274_v27  ;;  %v2346_v56 = vmul.f32 %v2336_v30, %v4282_v35  ;;  %v2347_v18 = vmul.f32 %v2336_v30, %v4290_v42  ;;  %v2348_v20 = vmul.f32 %v2336_v30, %v4298_v40  ;;  %v2365_v40 = vld [vmem:[%s4442_s8 + $0x60] sm:$0xff] }
 0x4a3   : > { %v2415_v1 = vadd.f32 %v2399_v33, %v2383_v55  ;;  %v2416_v27 = vadd.f32 %v2400_v34, %v2384_v53  ;;  %v2349_v35 = vmul.f32 %v2336_v30, %v4306_v51  ;;  %v2350_v42 = vmul.f32 %v2336_v30, %v4311_v38  ;;  %v2396_v30 = vld [vmem:[#allocation8 + $0x58] sm:$0xff]  ;;  %v2398_v34 = vld [vmem:[#allocation8 + $0x68] sm:$0xff] }
 0x4a4   : > { %v2369_v5 = vmul.f32 %v2353_v37, %v2337_v41  ;;  %v2370_v6 = vmul.f32 %v2354_v43, %v2338_v3  ;;  %v2371_v7 = vmul.f32 %v2355_v22, %v2339_v45  ;;  %v2372_v10 = vmul.f32 %v2356_v47, %v2340_v2 }
 0x4a5   : > { %v3458_v51 = vpack.c.bf16 %v2416_v27, %v2415_v1  ;;  %v2373_v13 = vmul.f32 %v2357_v49, %v2341_v44  ;;  %v2374_v38 = vmul.f32 %v2358_v50, %v2342_v46  ;;  %v2375_v14 = vmul.f32 %v2359_v52, %v2343_v61 }
 0x4a6   : > { %v2376_v17 = vmul.f32 %v2360_v57, %v2344_v9  ;;  %v2377_v19 = vmul.f32 %v2361_v59, %v2345_v60  ;;  %v2378_v23 = vmul.f32 %v2362_v62, %v2346_v56  ;;  %v2379_v24 = vmul.f32 %v2363_v63, %v2347_v18 }
 0x4a7   : > { %3466 = vst [vmem:[%s4390_s25 + $0x38] sm:$0xff] %v3458_v51   ;;  %v2380_v8 = vmul.f32 %v2364_v0, %v2348_v20  ;;  %v2381_v31 = vmul.f32 %v2365_v40, %v2349_v35  ;;  %v2382_v21 = vmul.f32 %v2366_v48, %v2350_v42  ;;  %v2401_v33 = vadd.f32 %v2385_v4, %v2369_v5 }
 0x4a8   : > { %v2402_v36 = vadd.f32 %v2386_v11, %v2370_v6  ;;  %v2403_v39 = vadd.f32 %v2387_v58, %v2371_v7  ;;  %v2404_v41 = vadd.f32 %v2388_v12, %v2372_v10  ;;  %v2405_v3 = vadd.f32 %v2389_v15, %v2373_v13 }
 0x4a9   : > { %v2406_v37 = vadd.f32 %v2390_v16, %v2374_v38  ;;  %v2407_v43 = vadd.f32 %v2391_v54, %v2375_v14  ;;  %v2408_v22 = vadd.f32 %v2392_v25, %v2376_v17  ;;  %v2409_v45 = vadd.f32 %v2393_v26, %v2377_v19 }
 0x4aa   : > { %v2410_v2 = vadd.f32 %v2394_v28, %v2378_v23  ;;  %v2411_v44 = vadd.f32 %v2395_v29, %v2379_v24  ;;  %v2412_v46 = vadd.f32 %v2396_v30, %v2380_v8  ;;  %v2413_v47 = vadd.f32 %v2397_v32, %v2381_v31 }
 0x4ab   : > { %v2414_v49 = vadd.f32 %v2398_v34, %v2382_v21  ;;  %v3423_v50 = vpack.c.bf16 %v2402_v36, %v2401_v33  ;;  %v3428_v55 = vpack.c.bf16 %v2404_v41, %v2403_v39  ;;  %v3433_v53 = vpack.c.bf16 %v2406_v37, %v2405_v3 }
 0x4ac   : > { %v3438_v61 = vpack.c.bf16 %v2408_v22, %v2407_v43  ;;  %v3443_v9 = vpack.c.bf16 %v2410_v2, %v2409_v45  ;;  %v3448_v52 = vpack.c.bf16 %v2412_v46, %v2411_v44 }
 0x4ad   : > { %3424 = vst [vmem:[%s4390_s25] sm:$0xff] %v3423_v50   ;;  %v3453_v57 = vpack.c.bf16 %v2414_v49, %v2413_v47 }
 0x4ae   : > { %3460 = vst [vmem:[%s4390_s25 + $0x8] sm:$0xff] %v3428_v55  }
 0x4af   : > { %3461 = vst [vmem:[%s4390_s25 + $0x10] sm:$0xff] %v3433_v53  }
 0x4b0   : > { %3462 = vst [vmem:[%s4390_s25 + $0x18] sm:$0xff] %v3438_v61  }
 0x4b1   : > { %3463 = vst [vmem:[%s4390_s25 + $0x20] sm:$0xff] %v3443_v9  }
 0x4b2   : > { %3464 = vst [vmem:[%s4390_s25 + $0x28] sm:$0xff] %v3448_v52  }
 0x4b3   : > { %3465 = vst [vmem:[%s4390_s25 + $0x30] sm:$0xff] %v3453_v57  }
 0x4b4   : > { %3745 = shalt.err (!%p3742_p8)
}
 0x4b5   : > { %s3804_s24 = smov 64   ;;  %s3805_s15 = smov 4  }
 0x4b6   : > { %3483 = dma.vmem_to_hbm [thread:$0]  (%p3899_p5), %s2463_s27, 1024, %s2465_s29, %s2450_s11, %s3804_s24, %s3804_s24, %s3805_s15  }
 0x4b7 PF: > { %p3510_p9 = scmp.ge.s32.totalorder %s3792_s16, 2  ;;  %s2479_s25 = sand.u32 1, %s3780_s13  }
 0x4b8   : > { %s2480_s20 = scalar_lea.sflag [#allocation4], %s2479_s25 }
 0x4b9   : > { %p3499_p10 = pnand %p3510_p9, %p3903_p6 }
 0x4bb   : > { %p3500_p11 = pneg %p3499_p10 }
 0x4bd   : > { %3775 = dma.done.wait (%p3500_p11), %s2480_s20, 1024  }
 0x4be   : > { %3777 = vsyncadd (%p3500_p11), %s2480_s20, 4294966272  ;;  %s4462_s16 = sld [smem:[#allocation16_spill]]  ;;  %s4465_s13 = smov %s3784_s14 }
 0x4bf   : > { %s4463_s19 = sld [smem:[#allocation15_spill]] }
 0x4c0   : > { %s4464_s15 = sld [smem:[#allocation17_spill]] }
 0x4c4   : > { %p23_p12 = scmp.ge.s32.totalorder %s4462_s16, 4  }
 0x4c5   : > { %s4466_s14 = smov %s4463_s19 }
 0x4c6   :  { %25 = sbr.rel (!%p23_p12) target bundleno = 9 (0x9), region = 126 }
 0x4cb   :  { %2486 = vsyncpa [#allocation3], 1 }
 0x4cc   :  { %2488 = vsyncpa [#allocation3 + $0x1], 1 }
 0x4cd   :  { %2489 = vsyncpa [#allocation6], 1 }
 0x4ce   :  { %2490 = vsyncpa [#allocation9], 1 }
 0x4cf   :  { %2491 = vsyncpa [#allocation4], 1 }
 0x4d0   :  { %2493 = vsyncpa [#allocation4 + $0x1], 1 }

</bundles_post_ra>
